<compile_context>
chip_gen: v6e
topology: v6e:2x2x1
jax: 0.10.0
libtpu: 0.0.40
codegen_flags: <defaults>
</compile_context>

<pallas_src>
import functools

import jax
import jax.numpy as jnp
from jax import lax
from jax.experimental import pallas as pl
from jax.experimental.pallas import tpu as pltpu

EPS = 1e-5  # torch.nn.LayerNorm default
F32 = jnp.float32
BF16 = jnp.bfloat16


def _round_up(v, m):
    return ((v + m - 1) // m) * m


def _arch_config():
    """Generation-aware (target_rows, vmem_limit_bytes)."""
    try:
        kind = jax.devices()[0].device_kind.lower().replace(" ", "")
    except Exception:
        kind = ""
    if "v7" in kind or "tpu7" in kind:
        return 128, 56 * 1024 * 1024          # v7x: 64 MiB physical VMEM per TC
    if "v5" in kind or "v6" in kind:
        return 256, 96 * 1024 * 1024          # v5e / v6e: 128 MiB physical VMEM
    return 256, 48 * 1024 * 1024              # unknown generation: conservative


def _pick_block_batch(B, T, target_rows, align=16):
    """Pick the per-step batch group Bb (rows = Bb*T).

    Preference order: fits the row target AND sublane-aligned AND leaves grid >= 2
    (megacore) > fits + aligned > fits > smallest aligned divisor (long-T fallback)
    > whole batch (block == full array, always legal)."""
    divisors = [b for b in range(1, B + 1) if B % b == 0]
    fits = [b for b in divisors if b * T <= target_rows]
    aligned = [b for b in fits if (b * T) % align == 0]
    mega = [b for b in aligned if B == 1 or b <= max(1, B // 2)]
    if mega:
        return max(mega)
    if aligned:
        return max(aligned)
    if fits:
        return max(fits)
    small_aligned = [b for b in divisors if (b * T) % align == 0]
    # TODO(synk): add a second ("arbitrary") grid axis tiling T for very long sequences.
    return min(small_aligned) if small_aligned else B


def rwkv_block_kernel(
    x_ref, dec0_ref, fst_ref,
    ln1_g_ref, ln1_b_ref, w1_ref, b1_ref, wto_ref, ag_ref,
    ln2_g_ref, ln2_b_ref, tmk_ref, omtmk_ref, wck_ref, w2_ref, fg_ref,
    out_ref, natt_ref, nffn_ref,
    xmix_ref,
    *, T, D, C, ffn_scale,
):
    x = x_ref[...].astype(F32)               # (M, Cp); padded lanes are zero
    M, Cp = x.shape
    Bb = M // T

    lane = lax.broadcasted_iota(jnp.int32, (1, Cp), 1)
    cmask = lane < C                          # valid-channel mask (row-broadcast)
    inv_c = 1.0 / C

    def layernorm(v, g, b):
        mu = jnp.sum(v, axis=-1, keepdims=True) * inv_c
        diff = jnp.where(cmask, v - mu, 0.0)
        var = jnp.sum(diff * diff, axis=-1, keepdims=True) * inv_c
        return diff * lax.rsqrt(var + EPS) * g + b

    # ---------------- time mixer (HierarchicalTimeAttention) ----------------
    xn1 = layernorm(x, ln1_g_ref[...], ln1_b_ref[...])
    # fused [v | k | r | level_logits] projection: bf16 MXU, f32 accumulation
    f1 = jnp.dot(xn1.astype(BF16), w1_ref[...],
                 preferred_element_type=F32) + b1_ref[...]
    v = f1[:, 0:Cp]
    k = f1[:, Cp:2 * Cp]
    r = jax.nn.sigmoid(f1[:, 2 * Cp:3 * Cp])
    logits = f1[:, 3 * Cp:]                   # padded level lanes carry -1e30 bias
    mx = jnp.max(logits, axis=-1, keepdims=True)
    e = jnp.exp(logits - mx)
    lw = e * pl.reciprocal(jnp.sum(e, axis=-1, keepdims=True), approx=True)  # (M, Dp)

    kv = k * v                                # (M, Cp)
    kv3 = kv.reshape(Bb, T, Cp)
    lw3 = lw.reshape(Bb, T, -1)
    ds = dec0_ref[...]                        # (Bb, D, Cp) = state0 * decay

    # Faithful to the reference loop: new_state[t, d] = state0[d]*decay[d] + kv[t], so
    # weighted[t] = kv[t] + sum_d lw[t, d] * state0[d]*decay[d]  (softmax weights sum to 1).
    w3 = kv3
    for d in range(D):                        # D is tiny (4): unrolled VPU broadcast-FMAs
        w3 = w3 + lw3[:, :, d:d + 1] * ds[:, d:d + 1, :]

    att_pre = r * w3.reshape(M, Cp)
    att_out = jnp.dot(att_pre.astype(BF16), wto_ref[...], preferred_element_type=F32)

    natt_ref[...] = (ds + kv3[:, T - 1:T, :]).astype(natt_ref.dtype)

    x1 = x + att_out * ag_ref[...]            # ag = sigmoid(att_gate), precomputed

    # ---------------- channel mixer (RWKVChannelMix, GLU) ----------------
    xn2 = layernorm(x1, ln2_g_ref[...], ln2_b_ref[...])
    # token shift: roll by one row, then overwrite only the Bb first-token rows from fst
    xmix_ref[...] = pltpu.roll(xn2, shift=1, axis=0)
    for b in range(Bb):
        xmix_ref[pl.ds(b * T, 1), :] = fst_ref[b]
    x_mix = xmix_ref[...]

    k_in = xn2 * tmk_ref[...] + x_mix * omtmk_ref[...]
    kk = jnp.dot(k_in.astype(BF16), wck_ref[...], preferred_element_type=F32)
    kk = jnp.square(jnp.maximum(kk, 0.0)).astype(BF16)     # relu(.)^2, kept narrow
    f2 = jnp.dot(kk, w2_ref[...], preferred_element_type=F32)   # fused [value | gate]
    vv = f2[:, 0:Cp]
    gg = f2[:, Cp:]
    ffn_out = vv * jax.nn.sigmoid(gg) * ffn_scale

    nffn_ref[...] = xn2.reshape(Bb, T, Cp)[:, T - 1:T, :].astype(nffn_ref.dtype)
    out_ref[...] = (x1 + ffn_out * fg_ref[...]).astype(out_ref.dtype)


def prepare_params(p):
    """One-time weight preparation (pad / fuse / cast). Reuse the result across steps."""
    C = p["wv"].shape[0]
    D = p["tdm"].shape[0]
    Cp = _round_up(C, 128)
    Dp = _round_up(D, 128)
    Hp = _round_up(4 * C, 128)

    def padw(w, rows, cols):
        w = w.astype(F32)
        return jnp.pad(w, ((0, rows - w.shape[0]), (0, cols - w.shape[1])))

    def padv(v):
        v = v.astype(F32).reshape(1, -1)
        return jnp.pad(v, ((0, 0), (0, Cp - v.shape[-1])))

    w1 = jnp.concatenate([padw(p["wv"], Cp, Cp), padw(p["wk"], Cp, Cp),
                          padw(p["wr"], Cp, Cp), padw(p["wls"], Cp, Dp)], axis=1).astype(BF16)
    bls = jnp.concatenate([p["bls"].astype(F32).reshape(1, D),
                           jnp.full((1, Dp - D), -1e30, F32)], axis=1)
    b1 = jnp.concatenate([jnp.zeros((1, 3 * Cp), F32), bls], axis=1)
    wto = padw(p["wto"], Cp, Cp).astype(BF16)
    wck = padw(p["wck"], Cp, Hp).astype(BF16)
    w2 = jnp.concatenate([padw(p["wcv"], Hp, Cp), padw(p["wcg"], Hp, Cp)], axis=1).astype(BF16)

    # decay = exp(-exp(tdm)) is a weight-derived constant, padded once
    decay = jnp.exp(-jnp.exp(p["tdm"].astype(F32)))              # (D, C)
    decay = jnp.pad(decay, ((0, 0), (0, Cp - C)))[None]          # (1, D, Cp)

    return {
        "C": C, "D": D, "Cp": Cp, "Dp": Dp, "Hp": Hp,
        "w1": w1, "b1": b1, "wto": wto, "wck": wck, "w2": w2,
        "ln1_g": padv(p["ln1_g"]), "ln1_b": padv(p["ln1_b"]),
        "ln2_g": padv(p["ln2_g"]), "ln2_b": padv(p["ln2_b"]),
        "tmk": padv(p["tmk"]), "omtmk": padv(1.0 - p["tmk"]),
        "sig_ag": padv(jax.nn.sigmoid(p["att_gate"])),
        "sig_fg": padv(jax.nn.sigmoid(p["ffn_gate"])),
        "decay": decay,
    }


def rwkv_block(x, prep, att_state=None, ffn_state=None, *, ffn_scale=1.0):
    B, T, C = x.shape
    assert C == prep["C"], "prepared params / input width mismatch"
    D, Cp = prep["D"], prep["Cp"]
    if att_state is None:
        att_state = jnp.zeros((B, D, C), F32)
    if ffn_state is None:
        ffn_state = jnp.zeros((B, C), F32)

    # per-call activation prep only (weight prep lives in prepare_params)
    dec0 = jnp.pad(att_state.astype(F32), ((0, 0), (0, 0), (0, Cp - C))) * prep["decay"]
    fst = jnp.pad(ffn_state.astype(F32), ((0, 0), (0, Cp - C)))[:, None, :]
    x2 = jnp.pad(x.astype(BF16), ((0, 0), (0, 0), (0, Cp - C))).reshape(B * T, Cp)

    target_rows, vmem_bytes = _arch_config()
    Bb = _pick_block_batch(B, T, target_rows)
    Mb = Bb * T
    M = B * T
    grid = (B // Bb,)

    def rows_map(i):
        return (i, 0)

    def bat_map(i):
        return (i, 0, 0)

    const_arrays = [prep["ln1_g"], prep["ln1_b"], prep["w1"], prep["b1"], prep["wto"],
                    prep["sig_ag"], prep["ln2_g"], prep["ln2_b"], prep["tmk"],
                    prep["omtmk"], prep["wck"], prep["w2"], prep["sig_fg"]]

    act_specs = [
        pl.BlockSpec((Mb, Cp), rows_map),        # x slab (bf16)
        pl.BlockSpec((Bb, D, Cp), bat_map),      # decayed att state (f32)
        pl.BlockSpec((Bb, 1, Cp), bat_map),      # ffn state (f32)
    ]
    out_shape = (
        jax.ShapeDtypeStruct((M, Cp), BF16),
        jax.ShapeDtypeStruct((B, D, Cp), F32),
        jax.ShapeDtypeStruct((B, 1, Cp), F32),
    )
    out_specs = (
        pl.BlockSpec((Mb, Cp), rows_map),
        pl.BlockSpec((Bb, D, Cp), bat_map),
        pl.BlockSpec((Bb, 1, Cp), bat_map),
    )

    def const_spec(shape, single_buffer):
        idx = lambda i, _nd=len(shape): (0,) * _nd
        if single_buffer and hasattr(pl, "Buffered"):
            try:
                return pl.BlockSpec(shape, idx, pipeline_mode=pl.Buffered(1))
            except TypeError:
                pass
        return pl.BlockSpec(shape, idx)

    def run(single_buffer):
        in_specs = act_specs + [const_spec(a.shape, single_buffer) for a in const_arrays]
        return pl.pallas_call(
            functools.partial(rwkv_block_kernel, T=T, D=D, C=C, ffn_scale=ffn_scale),
            out_shape=out_shape,
            grid_spec=pltpu.PrefetchScalarGridSpec(
                num_scalar_prefetch=0,
                grid=grid,
                in_specs=in_specs,
                out_specs=out_specs,
                scratch_shapes=[pltpu.VMEM((Mb, Cp), F32)],   # token-shift scratch
            ),
            compiler_params=pltpu.CompilerParams(
                dimension_semantics=("parallel",),
                vmem_limit_bytes=vmem_bytes,
            ),
        )(x2, dec0, fst, *const_arrays)

    try:
        out2, natt, nffn = run(True)
    except Exception:  # fall back if this JAX build rejects single-buffered pipeline_mode
        out2, natt, nffn = run(False)

    out = out2.reshape(B, T, Cp)[:, :, :C].astype(x.dtype)
    new_att = natt[:, :, :C].astype(x.dtype)
    new_ffn = nffn[:, 0, :C].astype(x.dtype)
    return out, new_att, new_ffn


# ----------------------------- pure-JAX reference -----------------------------
def _layernorm_ref(x, g, b):
    mu = jnp.mean(x, axis=-1, keepdims=True)
    var = jnp.mean((x - mu) ** 2, axis=-1, keepdims=True)
    return (x - mu) * lax.rsqrt(var + EPS) * g + b


def rwkv_block_ref(x, p, att_state=None, ffn_state=None, *, ffn_scale=1.0):
    B, T, C = x.shape
    D = p["tdm"].shape[0]
    if att_state is None:
        att_state = jnp.zeros((B, D, C), jnp.float32)
    if ffn_state is None:
        ffn_state = jnp.zeros((B, C), jnp.float32)
    xn1 = _layernorm_ref(x, p["ln1_g"], p["ln1_b"])
    v = xn1 @ p["wv"]
    k = xn1 @ p["wk"]
    r = jax.nn.sigmoid(xn1 @ p["wr"])
    lw = jax.nn.softmax(xn1 @ p["wls"] + p["bls"], axis=-1)
    decay = jnp.exp(-jnp.exp(p["tdm"]))
    decayed0 = att_state * decay
    kv = k * v
    weighted = (jnp.einsum("btd,bdc->btc", lw, decayed0)
                + jnp.sum(lw, -1, keepdims=True) * kv)
    att_out = (r * weighted) @ p["wto"]
    new_att = decayed0 + kv[:, -1:, :]
    x1 = x + att_out * jax.nn.sigmoid(p["att_gate"])
    xn2 = _layernorm_ref(x1, p["ln2_g"], p["ln2_b"])
    x_mix = jnp.concatenate([ffn_state[:, None, :], xn2[:, :-1]], axis=1)
    k_in = xn2 * p["tmk"] + x_mix * (1.0 - p["tmk"])
    kk = jnp.square(jax.nn.relu(k_in @ p["wck"]))
    ffn_out = (kk @ p["wcv"]) * jax.nn.sigmoid(kk @ p["wcg"]) * ffn_scale
    out = x1 + ffn_out * jax.nn.sigmoid(p["ffn_gate"])
    new_ffn = xn2[:, -1, :]
    return out, new_att, new_ffn


def make_params(key, C=32, D=4, layer_id=0, gate_init=0.001):
    ks = jax.random.split(key, 10)
    std_att = 0.02
    std_cm = 0.02 * (layer_id + 1)
    norm = lambda k, shape, std: (jax.random.normal(k, shape, jnp.float32) * std)
    tdm = jnp.stack([jnp.full((C,), 0.9 ** (d + 1), jnp.float32) for d in range(D)])
    return {
        "ln1_g": jnp.ones((1, C), jnp.float32),
        "ln1_b": jnp.zeros((1, C), jnp.float32),
        "wv": norm(ks[0], (C, C), std_att),
        "wk": norm(ks[1], (C, C), std_att),
        "wr": norm(ks[2], (C, C), std_att),
        "wls": norm(ks[3], (C, D), std_att),
        "bls": jnp.zeros((1, D), jnp.float32),
        "tdm": tdm,
        "wto": norm(ks[4], (C, C), std_att),
        "att_gate": jnp.full((1, C), gate_init, jnp.float32),
        "ln2_g": jnp.ones((1, C), jnp.float32),
        "ln2_b": jnp.zeros((1, C), jnp.float32),
        # non-trivial time-mix so the token-shift path is actually exercised
        "tmk": jax.random.uniform(ks[8], (1, C), jnp.float32, 0.2, 0.9),
        "wck": norm(ks[5], (C, 4 * C), std_cm),
        "wcv": norm(ks[6], (4 * C, C), std_cm),
        "wcg": norm(ks[7], (4 * C, C), std_cm),
        "ffn_gate": jnp.full((1, C), gate_init, jnp.float32),
    }


if __name__ == "__main__":
    B, T, C, D = 2, 8, 32, 4
    key = jax.random.PRNGKey(0)
    kx, kp, ka, kf = jax.random.split(key, 4)
    x = jax.random.normal(kx, (B, T, C), jnp.float32)
    params = make_params(kp, C=C, D=D, layer_id=0)
    prep = prepare_params(params)   # one-time weight prep, reused across calls

    # default (zero) recurrent states
    out, new_att, new_ffn = rwkv_block(x, prep)
    jax.block_until_ready((out, new_att, new_ffn))
    ref_out, ref_att, ref_ffn = rwkv_block_ref(x, params)
    assert out.shape == (B, T, C) and new_att.shape == (B, D, C) and new_ffn.shape == (B, C)
    assert jnp.allclose(out, ref_out, atol=2e-2, rtol=2e-2)
    assert jnp.allclose(new_att, ref_att, atol=2e-2, rtol=2e-2)
    assert jnp.allclose(new_ffn, ref_ffn, atol=2e-2, rtol=2e-2)

    # non-zero recurrent states (checks the state-dependent paths too)
    att_s = 0.5 * jax.random.normal(ka, (B, D, C), jnp.float32)
    ffn_s = 0.5 * jax.random.normal(kf, (B, C), jnp.float32)
    out2, new_att2, new_ffn2 = rwkv_block(x, prep, att_s, ffn_s)
    jax.block_until_ready((out2, new_att2, new_ffn2))
    r_out2, r_att2, r_ffn2 = rwkv_block_ref(x, params, att_s, ffn_s)
    assert jnp.allclose(out2, r_out2, atol=2e-2, rtol=2e-2)
    assert jnp.allclose(new_att2, r_att2, atol=2e-2, rtol=2e-2)
    assert jnp.allclose(new_ffn2, r_ffn2, atol=2e-2, rtol=2e-2)

    print("KERNEL_OK")
</pallas_src>

<mosaic_0001>
module attributes {stable_mosaic.version = 11 : i64} {
  func.func @rwkv_block_kernel(%arg0: i32, %arg1: memref<16x128xbf16, #tpu.memory_space<vmem>>, %arg2: memref<2x4x128xf32, #tpu.memory_space<vmem>>, %arg3: memref<2x1x128xf32, #tpu.memory_space<vmem>>, %arg4: memref<1x128xf32, #tpu.memory_space<vmem>>, %arg5: memref<1x128xf32, #tpu.memory_space<vmem>>, %arg6: memref<128x512xbf16, #tpu.memory_space<vmem>>, %arg7: memref<1x512xf32, #tpu.memory_space<vmem>>, %arg8: memref<128x128xbf16, #tpu.memory_space<vmem>>, %arg9: memref<1x128xf32, #tpu.memory_space<vmem>>, %arg10: memref<1x128xf32, #tpu.memory_space<vmem>>, %arg11: memref<1x128xf32, #tpu.memory_space<vmem>>, %arg12: memref<1x128xf32, #tpu.memory_space<vmem>>, %arg13: memref<1x128xf32, #tpu.memory_space<vmem>>, %arg14: memref<128x128xbf16, #tpu.memory_space<vmem>>, %arg15: memref<128x256xbf16, #tpu.memory_space<vmem>>, %arg16: memref<1x128xf32, #tpu.memory_space<vmem>>, %arg17: memref<16x128xbf16, #tpu.memory_space<vmem>>, %arg18: memref<2x4x128xf32, #tpu.memory_space<vmem>>, %arg19: memref<2x1x128xf32, #tpu.memory_space<vmem>>, %arg20: memref<16x128xf32, #tpu.memory_space<vmem>>) attributes {dimension_semantics = [#tpu.dimension_semantics<parallel>], iteration_bounds = array<i64: 1>, scalar_prefetch = 0 : i64, scratch_operands = 1 : i64, tpu.core_type = #tpu.core_type<tc>, window_params = [{transform_indices = @transform_0, window_bounds = array<i64: 16, 128>}, {transform_indices = @transform_1, window_bounds = array<i64: 2, 4, 128>}, {transform_indices = @transform_2, window_bounds = array<i64: 2, 1, 128>}, {pipeline_mode = #tpu.pipeline_mode<synchronous>, transform_indices = @transform_3, window_bounds = array<i64: 1, 128>}, {pipeline_mode = #tpu.pipeline_mode<synchronous>, transform_indices = @transform_4, window_bounds = array<i64: 1, 128>}, {pipeline_mode = #tpu.pipeline_mode<synchronous>, transform_indices = @transform_5, window_bounds = array<i64: 128, 512>}, {pipeline_mode = #tpu.pipeline_mode<synchronous>, transform_indices = @transform_6, window_bounds = array<i64: 1, 512>}, {pipeline_mode = #tpu.pipeline_mode<synchronous>, transform_indices = @transform_7, window_bounds = array<i64: 128, 128>}, {pipeline_mode = #tpu.pipeline_mode<synchronous>, transform_indices = @transform_8, window_bounds = array<i64: 1, 128>}, {pipeline_mode = #tpu.pipeline_mode<synchronous>, transform_indices = @transform_9, window_bounds = array<i64: 1, 128>}, {pipeline_mode = #tpu.pipeline_mode<synchronous>, transform_indices = @transform_10, window_bounds = array<i64: 1, 128>}, {pipeline_mode = #tpu.pipeline_mode<synchronous>, transform_indices = @transform_11, window_bounds = array<i64: 1, 128>}, {pipeline_mode = #tpu.pipeline_mode<synchronous>, transform_indices = @transform_12, window_bounds = array<i64: 1, 128>}, {pipeline_mode = #tpu.pipeline_mode<synchronous>, transform_indices = @transform_13, window_bounds = array<i64: 128, 128>}, {pipeline_mode = #tpu.pipeline_mode<synchronous>, transform_indices = @transform_14, window_bounds = array<i64: 128, 256>}, {pipeline_mode = #tpu.pipeline_mode<synchronous>, transform_indices = @transform_15, window_bounds = array<i64: 1, 128>}, {transform_indices = @transform_16, window_bounds = array<i64: 16, 128>}, {transform_indices = @transform_17, window_bounds = array<i64: 2, 4, 128>}, {transform_indices = @transform_18, window_bounds = array<i64: 2, 1, 128>}]} {
    %c0 = arith.constant 0 : index
    %c0_0 = arith.constant 0 : index
    %0 = vector.load %arg1[%c0, %c0_0] : memref<16x128xbf16, #tpu.memory_space<vmem>>, vector<16x128xbf16>
    %1 = arith.extf %0 : vector<16x128xbf16> to vector<16x128xf32>
    %2 = tpu.iota {dimensions = array<i32: 1>} : vector<1x128xi32>
    %c32_i32 = arith.constant 32 : i32
    %3 = vector.broadcast %c32_i32 : i32 to vector<1x128xi32>
    %4 = arith.cmpi slt, %2, %3 : vector<1x128xi32>
    %c0_1 = arith.constant 0 : index
    %c0_2 = arith.constant 0 : index
    %5 = vector.load %arg4[%c0_1, %c0_2] : memref<1x128xf32, #tpu.memory_space<vmem>>, vector<1x128xf32>
    %c0_3 = arith.constant 0 : index
    %c0_4 = arith.constant 0 : index
    %6 = vector.load %arg5[%c0_3, %c0_4] : memref<1x128xf32, #tpu.memory_space<vmem>>, vector<1x128xf32>
    %cst = arith.constant dense<0.000000e+00> : vector<16xf32>
    %7 = vector.multi_reduction <add>, %1, %cst [1] : vector<16x128xf32> to vector<16xf32>
    %8 = vector.shape_cast %7 : vector<16xf32> to vector<16x1xf32>
    %cst_5 = arith.constant 3.125000e-02 : f32
    %9 = vector.broadcast %cst_5 : f32 to vector<16x1xf32>
    %10 = arith.mulf %8, %9 : vector<16x1xf32>
    %11 = vector.broadcast %10 : vector<16x1xf32> to vector<16x128xf32>
    %12 = arith.subf %1, %11 : vector<16x128xf32>
    %cst_6 = arith.constant 0.000000e+00 : f32
    %13 = vector.shape_cast %4 : vector<1x128xi1> to vector<1x128xi1>
    %14 = vector.broadcast %13 : vector<1x128xi1> to vector<16x128xi1>
    %15 = vector.broadcast %cst_6 : f32 to vector<16x128xf32>
    %16 = arith.select %14, %12, %15 : vector<16x128xi1>, vector<16x128xf32>
    %17 = arith.mulf %16, %16 : vector<16x128xf32>
    %cst_7 = arith.constant dense<0.000000e+00> : vector<16xf32>
    %18 = vector.multi_reduction <add>, %17, %cst_7 [1] : vector<16x128xf32> to vector<16xf32>
    %19 = vector.shape_cast %18 : vector<16xf32> to vector<16x1xf32>
    %cst_8 = arith.constant 3.125000e-02 : f32
    %20 = vector.broadcast %cst_8 : f32 to vector<16x1xf32>
    %21 = arith.mulf %19, %20 : vector<16x1xf32>
    %cst_9 = arith.constant 9.99999974E-6 : f32
    %22 = vector.broadcast %cst_9 : f32 to vector<16x1xf32>
    %23 = arith.addf %21, %22 : vector<16x1xf32>
    %24 = math.rsqrt %23 : vector<16x1xf32>
    %25 = vector.broadcast %24 : vector<16x1xf32> to vector<16x128xf32>
    %26 = arith.mulf %16, %25 : vector<16x128xf32>
    %27 = vector.broadcast %5 : vector<1x128xf32> to vector<16x128xf32>
    %28 = arith.mulf %26, %27 : vector<16x128xf32>
    %29 = vector.broadcast %6 : vector<1x128xf32> to vector<16x128xf32>
    %30 = arith.addf %28, %29 : vector<16x128xf32>
    %31 = arith.truncf %30 : vector<16x128xf32> to vector<16x128xbf16>
    %c0_10 = arith.constant 0 : index
    %c0_11 = arith.constant 0 : index
    %32 = vector.load %arg6[%c0_10, %c0_11] : memref<128x512xbf16, #tpu.memory_space<vmem>>, vector<128x512xbf16>
    %cst_12 = arith.constant dense<0.000000e+00> : vector<16x512xf32>
    %33 = tpu.matmul %31, %32, %cst_12 {dimension_numbers = #tpu.dot_dimension_numbers<[1], [0], [0], [1], [0, 0, 1, 1], [], []>} : vector<16x128xbf16>, vector<128x512xbf16>, vector<16x512xf32> -> vector<16x512xf32>
    %c0_13 = arith.constant 0 : index
    %c0_14 = arith.constant 0 : index
    %34 = vector.load %arg7[%c0_13, %c0_14] : memref<1x512xf32, #tpu.memory_space<vmem>>, vector<1x512xf32>
    %35 = vector.broadcast %34 : vector<1x512xf32> to vector<16x512xf32>
    %36 = arith.addf %33, %35 : vector<16x512xf32>
    %37 = vector.extract_strided_slice %36 {offsets = [0, 0], sizes = [16, 128], strides = [1, 1]} : vector<16x512xf32> to vector<16x128xf32>
    %38 = vector.extract_strided_slice %36 {offsets = [0, 128], sizes = [16, 128], strides = [1, 1]} : vector<16x512xf32> to vector<16x128xf32>
    %39 = vector.extract_strided_slice %36 {offsets = [0, 256], sizes = [16, 128], strides = [1, 1]} : vector<16x512xf32> to vector<16x128xf32>
    %40 = arith.negf %39 : vector<16x128xf32>
    %41 = math.exp %40 : vector<16x128xf32>
    %cst_15 = arith.constant 1.000000e+00 : f32
    %42 = vector.broadcast %cst_15 : f32 to vector<16x128xf32>
    %43 = arith.addf %42, %41 : vector<16x128xf32>
    %44 = arith.divf %42, %43 : vector<16x128xf32>
    %45 = vector.extract_strided_slice %36 {offsets = [0, 384], sizes = [16, 128], strides = [1, 1]} : vector<16x512xf32> to vector<16x128xf32>
    %cst_16 = arith.constant dense<0xFF800000> : vector<16xf32>
    %46 = vector.multi_reduction <maximumf>, %45, %cst_16 [1] : vector<16x128xf32> to vector<16xf32>
    %47 = vector.shape_cast %46 : vector<16xf32> to vector<16x1xf32>
    %48 = vector.broadcast %47 : vector<16x1xf32> to vector<16x128xf32>
    %49 = arith.subf %45, %48 : vector<16x128xf32>
    %50 = math.exp %49 : vector<16x128xf32>
    %cst_17 = arith.constant dense<0.000000e+00> : vector<16xf32>
    %51 = vector.multi_reduction <add>, %50, %cst_17 [1] : vector<16x128xf32> to vector<16xf32>
    %52 = vector.shape_cast %51 : vector<16xf32> to vector<16x1xf32>
    %53 = tpu.reciprocal %52 {approx = true} : vector<16x1xf32> -> vector<16x1xf32>
    %54 = vector.broadcast %53 : vector<16x1xf32> to vector<16x128xf32>
    %55 = arith.mulf %50, %54 : vector<16x128xf32>
    %56 = arith.mulf %38, %37 : vector<16x128xf32>
    %57 = vector.shape_cast %56 : vector<16x128xf32> to vector<2x8x128xf32>
    %58 = vector.shape_cast %55 : vector<16x128xf32> to vector<2x8x128xf32>
    %c0_18 = arith.constant 0 : index
    %c0_19 = arith.constant 0 : index
    %c0_20 = arith.constant 0 : index
    %59 = vector.load %arg2[%c0_18, %c0_19, %c0_20] : memref<2x4x128xf32, #tpu.memory_space<vmem>>, vector<2x4x128xf32>
    %60 = vector.extract_strided_slice %58 {offsets = [0, 0, 0], sizes = [2, 8, 1], strides = [1, 1, 1]} : vector<2x8x128xf32> to vector<2x8x1xf32>
    %61 = vector.extract_strided_slice %59 {offsets = [0, 0, 0], sizes = [2, 1, 128], strides = [1, 1, 1]} : vector<2x4x128xf32> to vector<2x1x128xf32>
    %62 = vector.broadcast %60 : vector<2x8x1xf32> to vector<2x8x128xf32>
    %63 = vector.broadcast %61 : vector<2x1x128xf32> to vector<2x8x128xf32>
    %64 = arith.mulf %62, %63 : vector<2x8x128xf32>
    %65 = arith.addf %57, %64 : vector<2x8x128xf32>
    %66 = vector.extract_strided_slice %58 {offsets = [0, 0, 1], sizes = [2, 8, 1], strides = [1, 1, 1]} : vector<2x8x128xf32> to vector<2x8x1xf32>
    %67 = vector.extract_strided_slice %59 {offsets = [0, 1, 0], sizes = [2, 1, 128], strides = [1, 1, 1]} : vector<2x4x128xf32> to vector<2x1x128xf32>
    %68 = vector.broadcast %66 : vector<2x8x1xf32> to vector<2x8x128xf32>
    %69 = vector.broadcast %67 : vector<2x1x128xf32> to vector<2x8x128xf32>
    %70 = arith.mulf %68, %69 : vector<2x8x128xf32>
    %71 = arith.addf %65, %70 : vector<2x8x128xf32>
    %72 = vector.extract_strided_slice %58 {offsets = [0, 0, 2], sizes = [2, 8, 1], strides = [1, 1, 1]} : vector<2x8x128xf32> to vector<2x8x1xf32>
    %73 = vector.extract_strided_slice %59 {offsets = [0, 2, 0], sizes = [2, 1, 128], strides = [1, 1, 1]} : vector<2x4x128xf32> to vector<2x1x128xf32>
    %74 = vector.broadcast %72 : vector<2x8x1xf32> to vector<2x8x128xf32>
    %75 = vector.broadcast %73 : vector<2x1x128xf32> to vector<2x8x128xf32>
    %76 = arith.mulf %74, %75 : vector<2x8x128xf32>
    %77 = arith.addf %71, %76 : vector<2x8x128xf32>
    %78 = vector.extract_strided_slice %58 {offsets = [0, 0, 3], sizes = [2, 8, 1], strides = [1, 1, 1]} : vector<2x8x128xf32> to vector<2x8x1xf32>
    %79 = vector.extract_strided_slice %59 {offsets = [0, 3, 0], sizes = [2, 1, 128], strides = [1, 1, 1]} : vector<2x4x128xf32> to vector<2x1x128xf32>
    %80 = vector.broadcast %78 : vector<2x8x1xf32> to vector<2x8x128xf32>
    %81 = vector.broadcast %79 : vector<2x1x128xf32> to vector<2x8x128xf32>
    %82 = arith.mulf %80, %81 : vector<2x8x128xf32>
    %83 = arith.addf %77, %82 : vector<2x8x128xf32>
    %84 = vector.shape_cast %83 : vector<2x8x128xf32> to vector<16x128xf32>
    %85 = arith.mulf %44, %84 : vector<16x128xf32>
    %86 = arith.truncf %85 : vector<16x128xf32> to vector<16x128xbf16>
    %c0_21 = arith.constant 0 : index
    %c0_22 = arith.constant 0 : index
    %87 = vector.load %arg8[%c0_21, %c0_22] : memref<128x128xbf16, #tpu.memory_space<vmem>>, vector<128x128xbf16>
    %cst_23 = arith.constant dense<0.000000e+00> : vector<16x128xf32>
    %88 = tpu.matmul %86, %87, %cst_23 {dimension_numbers = #tpu.dot_dimension_numbers<[1], [0], [0], [1], [0, 0, 1, 1], [], []>} : vector<16x128xbf16>, vector<128x128xbf16>, vector<16x128xf32> -> vector<16x128xf32>
    %89 = vector.extract_strided_slice %57 {offsets = [0, 7, 0], sizes = [2, 1, 128], strides = [1, 1, 1]} : vector<2x8x128xf32> to vector<2x1x128xf32>
    %90 = vector.broadcast %89 : vector<2x1x128xf32> to vector<2x4x128xf32>
    %91 = arith.addf %59, %90 : vector<2x4x128xf32>
    %c0_24 = arith.constant 0 : index
    %c0_25 = arith.constant 0 : index
    %c0_26 = arith.constant 0 : index
    %92 = vector.load %arg18[%c0_24, %c0_25, %c0_26] : memref<2x4x128xf32, #tpu.memory_space<vmem>>, vector<2x4x128xf32>
    tpu.vector_store %arg18[%c0_24, %c0_25, %c0_26], %91 {strides = array<i32>} : memref<2x4x128xf32, #tpu.memory_space<vmem>>, vector<2x4x128xf32>,
    %c0_27 = arith.constant 0 : index
    %c0_28 = arith.constant 0 : index
    %93 = vector.load %arg9[%c0_27, %c0_28] : memref<1x128xf32, #tpu.memory_space<vmem>>, vector<1x128xf32>
    %94 = vector.broadcast %93 : vector<1x128xf32> to vector<16x128xf32>
    %95 = arith.mulf %88, %94 : vector<16x128xf32>
    %96 = arith.addf %1, %95 : vector<16x128xf32>
    %c0_29 = arith.constant 0 : index
    %c0_30 = arith.constant 0 : index
    %97 = vector.load %arg10[%c0_29, %c0_30] : memref<1x128xf32, #tpu.memory_space<vmem>>, vector<1x128xf32>
    %c0_31 = arith.constant 0 : index
    %c0_32 = arith.constant 0 : index
    %98 = vector.load %arg11[%c0_31, %c0_32] : memref<1x128xf32, #tpu.memory_space<vmem>>, vector<1x128xf32>
    %cst_33 = arith.constant dense<0.000000e+00> : vector<16xf32>
    %99 = vector.multi_reduction <add>, %96, %cst_33 [1] : vector<16x128xf32> to vector<16xf32>
    %100 = vector.shape_cast %99 : vector<16xf32> to vector<16x1xf32>
    %cst_34 = arith.constant 3.125000e-02 : f32
    %101 = vector.broadcast %cst_34 : f32 to vector<16x1xf32>
    %102 = arith.mulf %100, %101 : vector<16x1xf32>
    %103 = vector.broadcast %102 : vector<16x1xf32> to vector<16x128xf32>
    %104 = arith.subf %96, %103 : vector<16x128xf32>
    %cst_35 = arith.constant 0.000000e+00 : f32
    %105 = vector.shape_cast %4 : vector<1x128xi1> to vector<1x128xi1>
    %106 = vector.broadcast %105 : vector<1x128xi1> to vector<16x128xi1>
    %107 = vector.broadcast %cst_35 : f32 to vector<16x128xf32>
    %108 = arith.select %106, %104, %107 : vector<16x128xi1>, vector<16x128xf32>
    %109 = arith.mulf %108, %108 : vector<16x128xf32>
    %cst_36 = arith.constant dense<0.000000e+00> : vector<16xf32>
    %110 = vector.multi_reduction <add>, %109, %cst_36 [1] : vector<16x128xf32> to vector<16xf32>
    %111 = vector.shape_cast %110 : vector<16xf32> to vector<16x1xf32>
    %cst_37 = arith.constant 3.125000e-02 : f32
    %112 = vector.broadcast %cst_37 : f32 to vector<16x1xf32>
    %113 = arith.mulf %111, %112 : vector<16x1xf32>
    %cst_38 = arith.constant 9.99999974E-6 : f32
    %114 = vector.broadcast %cst_38 : f32 to vector<16x1xf32>
    %115 = arith.addf %113, %114 : vector<16x1xf32>
    %116 = math.rsqrt %115 : vector<16x1xf32>
    %117 = vector.broadcast %116 : vector<16x1xf32> to vector<16x128xf32>
    %118 = arith.mulf %108, %117 : vector<16x128xf32>
    %119 = vector.broadcast %97 : vector<1x128xf32> to vector<16x128xf32>
    %120 = arith.mulf %118, %119 : vector<16x128xf32>
    %121 = vector.broadcast %98 : vector<1x128xf32> to vector<16x128xf32>
    %122 = arith.addf %120, %121 : vector<16x128xf32>
    %c1_i32 = arith.constant 1 : i32
    %123 = tpu.dynamic_rotate %122 by %c1_i32 dim 0 : vector<16x128xf32>, i32 -> vector<16x128xf32>
    %c0_39 = arith.constant 0 : index
    %c0_40 = arith.constant 0 : index
    %124 = vector.load %arg20[%c0_39, %c0_40] : memref<16x128xf32, #tpu.memory_space<vmem>>, vector<16x128xf32>
    tpu.vector_store %arg20[%c0_39, %c0_40], %123 {strides = array<i32>} : memref<16x128xf32, #tpu.memory_space<vmem>>, vector<16x128xf32>,
    %c0_41 = arith.constant 0 : index
    %c0_42 = arith.constant 0 : index
    %c0_43 = arith.constant 0 : index
    %125 = vector.load %arg3[%c0_41, %c0_42, %c0_43] : memref<2x1x128xf32, #tpu.memory_space<vmem>>, vector<1x1x128xf32>
    %126 = vector.shape_cast %125 : vector<1x1x128xf32> to vector<1x128xf32>
    %c0_44 = arith.constant 0 : index
    %c0_45 = arith.constant 0 : index
    %127 = vector.load %arg20[%c0_44, %c0_45] : memref<16x128xf32, #tpu.memory_space<vmem>>, vector<1x128xf32>
    tpu.vector_store %arg20[%c0_44, %c0_45], %126 {strides = array<i32>} : memref<16x128xf32, #tpu.memory_space<vmem>>, vector<1x128xf32>,
    %c1 = arith.constant 1 : index
    %c0_46 = arith.constant 0 : index
    %c0_47 = arith.constant 0 : index
    %128 = vector.load %arg3[%c1, %c0_46, %c0_47] : memref<2x1x128xf32, #tpu.memory_space<vmem>>, vector<1x1x128xf32>
    %129 = vector.shape_cast %128 : vector<1x1x128xf32> to vector<1x128xf32>
    %c8 = arith.constant 8 : index
    %c0_48 = arith.constant 0 : index
    %130 = vector.load %arg20[%c8, %c0_48] : memref<16x128xf32, #tpu.memory_space<vmem>>, vector<1x128xf32>
    tpu.vector_store %arg20[%c8, %c0_48], %129 {strides = array<i32>} : memref<16x128xf32, #tpu.memory_space<vmem>>, vector<1x128xf32>,
    %c0_49 = arith.constant 0 : index
    %c0_50 = arith.constant 0 : index
    %131 = vector.load %arg20[%c0_49, %c0_50] : memref<16x128xf32, #tpu.memory_space<vmem>>, vector<16x128xf32>
    %c0_51 = arith.constant 0 : index
    %c0_52 = arith.constant 0 : index
    %132 = vector.load %arg12[%c0_51, %c0_52] : memref<1x128xf32, #tpu.memory_space<vmem>>, vector<1x128xf32>
    %133 = vector.broadcast %132 : vector<1x128xf32> to vector<16x128xf32>
    %134 = arith.mulf %122, %133 : vector<16x128xf32>
    %c0_53 = arith.constant 0 : index
    %c0_54 = arith.constant 0 : index
    %135 = vector.load %arg13[%c0_53, %c0_54] : memref<1x128xf32, #tpu.memory_space<vmem>>, vector<1x128xf32>
    %136 = vector.broadcast %135 : vector<1x128xf32> to vector<16x128xf32>
    %137 = arith.mulf %131, %136 : vector<16x128xf32>
    %138 = arith.addf %134, %137 : vector<16x128xf32>
    %139 = arith.truncf %138 : vector<16x128xf32> to vector<16x128xbf16>
    %c0_55 = arith.constant 0 : index
    %c0_56 = arith.constant 0 : index
    %140 = vector.load %arg14[%c0_55, %c0_56] : memref<128x128xbf16, #tpu.memory_space<vmem>>, vector<128x128xbf16>
    %cst_57 = arith.constant dense<0.000000e+00> : vector<16x128xf32>
    %141 = tpu.matmul %139, %140, %cst_57 {dimension_numbers = #tpu.dot_dimension_numbers<[1], [0], [0], [1], [0, 0, 1, 1], [], []>} : vector<16x128xbf16>, vector<128x128xbf16>, vector<16x128xf32> -> vector<16x128xf32>
    %cst_58 = arith.constant 0.000000e+00 : f32
    %142 = vector.broadcast %cst_58 : f32 to vector<16x128xf32>
    %143 = arith.maximumf %141, %142 : vector<16x128xf32>
    %144 = arith.mulf %143, %143 : vector<16x128xf32>
    %145 = arith.truncf %144 : vector<16x128xf32> to vector<16x128xbf16>
    %c0_59 = arith.constant 0 : index
    %c0_60 = arith.constant 0 : index
    %146 = vector.load %arg15[%c0_59, %c0_60] : memref<128x256xbf16, #tpu.memory_space<vmem>>, vector<128x256xbf16>
    %cst_61 = arith.constant dense<0.000000e+00> : vector<16x256xf32>
    %147 = tpu.matmul %145, %146, %cst_61 {dimension_numbers = #tpu.dot_dimension_numbers<[1], [0], [0], [1], [0, 0, 1, 1], [], []>} : vector<16x128xbf16>, vector<128x256xbf16>, vector<16x256xf32> -> vector<16x256xf32>
    %148 = vector.extract_strided_slice %147 {offsets = [0, 0], sizes = [16, 128], strides = [1, 1]} : vector<16x256xf32> to vector<16x128xf32>
    %149 = vector.extract_strided_slice %147 {offsets = [0, 128], sizes = [16, 128], strides = [1, 1]} : vector<16x256xf32> to vector<16x128xf32>
    %150 = arith.negf %149 : vector<16x128xf32>
    %151 = math.exp %150 : vector<16x128xf32>
    %cst_62 = arith.constant 1.000000e+00 : f32
    %152 = vector.broadcast %cst_62 : f32 to vector<16x128xf32>
    %153 = arith.addf %152, %151 : vector<16x128xf32>
    %154 = arith.divf %152, %153 : vector<16x128xf32>
    %155 = arith.mulf %148, %154 : vector<16x128xf32>
    %cst_63 = arith.constant 1.000000e+00 : f32
    %156 = vector.broadcast %cst_63 : f32 to vector<16x128xf32>
    %157 = arith.mulf %155, %156 : vector<16x128xf32>
    %158 = vector.shape_cast %122 : vector<16x128xf32> to vector<2x8x128xf32>
    %159 = vector.extract_strided_slice %158 {offsets = [0, 7, 0], sizes = [2, 1, 128], strides = [1, 1, 1]} : vector<2x8x128xf32> to vector<2x1x128xf32>
    %c0_64 = arith.constant 0 : index
    %c0_65 = arith.constant 0 : index
    %c0_66 = arith.constant 0 : index
    %160 = vector.load %arg19[%c0_64, %c0_65, %c0_66] : memref<2x1x128xf32, #tpu.memory_space<vmem>>, vector<2x1x128xf32>
    tpu.vector_store %arg19[%c0_64, %c0_65, %c0_66], %159 {strides = array<i32>} : memref<2x1x128xf32, #tpu.memory_space<vmem>>, vector<2x1x128xf32>,
    %c0_67 = arith.constant 0 : index
    %c0_68 = arith.constant 0 : index
    %161 = vector.load %arg16[%c0_67, %c0_68] : memref<1x128xf32, #tpu.memory_space<vmem>>, vector<1x128xf32>
    %162 = vector.broadcast %161 : vector<1x128xf32> to vector<16x128xf32>
    %163 = arith.mulf %157, %162 : vector<16x128xf32>
    %164 = arith.addf %96, %163 : vector<16x128xf32>
    %165 = arith.truncf %164 : vector<16x128xf32> to vector<16x128xbf16>
    %c0_69 = arith.constant 0 : index
    %c0_70 = arith.constant 0 : index
    %166 = vector.load %arg17[%c0_69, %c0_70] : memref<16x128xbf16, #tpu.memory_space<vmem>>, vector<16x128xbf16>
    tpu.vector_store %arg17[%c0_69, %c0_70], %165 {strides = array<i32>} : memref<16x128xbf16, #tpu.memory_space<vmem>>, vector<16x128xbf16>,
    return
  }
  func.func @transform_0(%arg0: i32) -> (i32, i32) {
    %c0_i32 = arith.constant 0 : i32
    %c0_i32_0 = arith.constant 0 : i32
    return %arg0, %c0_i32 : i32, i32
  }
  func.func @transform_1(%arg0: i32) -> (i32, i32, i32) {
    %c0_i32 = arith.constant 0 : i32
    %c0_i32_0 = arith.constant 0 : i32
    %c0_i32_1 = arith.constant 0 : i32
    return %arg0, %c0_i32, %c0_i32_0 : i32, i32, i32
  }
  func.func @transform_2(%arg0: i32) -> (i32, i32, i32) {
    %c0_i32 = arith.constant 0 : i32
    %c0_i32_0 = arith.constant 0 : i32
    %c0_i32_1 = arith.constant 0 : i32
    return %arg0, %c0_i32, %c0_i32_0 : i32, i32, i32
  }
  func.func @transform_3(%arg0: i32) -> (i32, i32) {
    %c0_i32 = arith.constant 0 : i32
    %c0_i32_0 = arith.constant 0 : i32
    %c0_i32_1 = arith.constant 0 : i32
    return %c0_i32, %c0_i32_0 : i32, i32
  }
  func.func @transform_4(%arg0: i32) -> (i32, i32) {
    %c0_i32 = arith.constant 0 : i32
    %c0_i32_0 = arith.constant 0 : i32
    %c0_i32_1 = arith.constant 0 : i32
    return %c0_i32, %c0_i32_0 : i32, i32
  }
  func.func @transform_5(%arg0: i32) -> (i32, i32) {
    %c0_i32 = arith.constant 0 : i32
    %c0_i32_0 = arith.constant 0 : i32
    %c0_i32_1 = arith.constant 0 : i32
    return %c0_i32, %c0_i32_0 : i32, i32
  }
  func.func @transform_6(%arg0: i32) -> (i32, i32) {
    %c0_i32 = arith.constant 0 : i32
    %c0_i32_0 = arith.constant 0 : i32
    %c0_i32_1 = arith.constant 0 : i32
    return %c0_i32, %c0_i32_0 : i32, i32
  }
  func.func @transform_7(%arg0: i32) -> (i32, i32) {
    %c0_i32 = arith.constant 0 : i32
    %c0_i32_0 = arith.constant 0 : i32
    %c0_i32_1 = arith.constant 0 : i32
    return %c0_i32, %c0_i32_0 : i32, i32
  }
  func.func @transform_8(%arg0: i32) -> (i32, i32) {
    %c0_i32 = arith.constant 0 : i32
    %c0_i32_0 = arith.constant 0 : i32
    %c0_i32_1 = arith.constant 0 : i32
    return %c0_i32, %c0_i32_0 : i32, i32
  }
  func.func @transform_9(%arg0: i32) -> (i32, i32) {
    %c0_i32 = arith.constant 0 : i32
    %c0_i32_0 = arith.constant 0 : i32
    %c0_i32_1 = arith.constant 0 : i32
    return %c0_i32, %c0_i32_0 : i32, i32
  }
  func.func @transform_10(%arg0: i32) -> (i32, i32) {
    %c0_i32 = arith.constant 0 : i32
    %c0_i32_0 = arith.constant 0 : i32
    %c0_i32_1 = arith.constant 0 : i32
    return %c0_i32, %c0_i32_0 : i32, i32
  }
  func.func @transform_11(%arg0: i32) -> (i32, i32) {
    %c0_i32 = arith.constant 0 : i32
    %c0_i32_0 = arith.constant 0 : i32
    %c0_i32_1 = arith.constant 0 : i32
    return %c0_i32, %c0_i32_0 : i32, i32
  }
  func.func @transform_12(%arg0: i32) -> (i32, i32) {
    %c0_i32 = arith.constant 0 : i32
    %c0_i32_0 = arith.constant 0 : i32
    %c0_i32_1 = arith.constant 0 : i32
    return %c0_i32, %c0_i32_0 : i32, i32
  }
  func.func @transform_13(%arg0: i32) -> (i32, i32) {
    %c0_i32 = arith.constant 0 : i32
    %c0_i32_0 = arith.constant 0 : i32
    %c0_i32_1 = arith.constant 0 : i32
    return %c0_i32, %c0_i32_0 : i32, i32
  }
  func.func @transform_14(%arg0: i32) -> (i32, i32) {
    %c0_i32 = arith.constant 0 : i32
    %c0_i32_0 = arith.constant 0 : i32
    %c0_i32_1 = arith.constant 0 : i32
    return %c0_i32, %c0_i32_0 : i32, i32
  }
  func.func @transform_15(%arg0: i32) -> (i32, i32) {
    %c0_i32 = arith.constant 0 : i32
    %c0_i32_0 = arith.constant 0 : i32
    %c0_i32_1 = arith.constant 0 : i32
    return %c0_i32, %c0_i32_0 : i32, i32
  }
  func.func @transform_16(%arg0: i32) -> (i32, i32) {
    %c0_i32 = arith.constant 0 : i32
    %c0_i32_0 = arith.constant 0 : i32
    return %arg0, %c0_i32 : i32, i32
  }
  func.func @transform_17(%arg0: i32) -> (i32, i32, i32) {
    %c0_i32 = arith.constant 0 : i32
    %c0_i32_0 = arith.constant 0 : i32
    %c0_i32_1 = arith.constant 0 : i32
    return %arg0, %c0_i32, %c0_i32_0 : i32, i32, i32
  }
  func.func @transform_18(%arg0: i32) -> (i32, i32, i32) {
    %c0_i32 = arith.constant 0 : i32
    %c0_i32_0 = arith.constant 0 : i32
    %c0_i32_1 = arith.constant 0 : i32
    return %arg0, %c0_i32, %c0_i32_0 : i32, i32, i32
  }
}

module attributes {stable_mosaic.version = 11 : i64} {
  func.func @rwkv_block_kernel(%arg0: i32, %arg1: memref<16x128xbf16, #tpu.memory_space<vmem>>, %arg2: memref<2x4x128xf32, #tpu.memory_space<vmem>>, %arg3: memref<2x1x128xf32, #tpu.memory_space<vmem>>, %arg4: memref<1x128xf32, #tpu.memory_space<vmem>>, %arg5: memref<1x128xf32, #tpu.memory_space<vmem>>, %arg6: memref<128x512xbf16, #tpu.memory_space<vmem>>, %arg7: memref<1x512xf32, #tpu.memory_space<vmem>>, %arg8: memref<128x128xbf16, #tpu.memory_space<vmem>>, %arg9: memref<1x128xf32, #tpu.memory_space<vmem>>, %arg10: memref<1x128xf32, #tpu.memory_space<vmem>>, %arg11: memref<1x128xf32, #tpu.memory_space<vmem>>, %arg12: memref<1x128xf32, #tpu.memory_space<vmem>>, %arg13: memref<1x128xf32, #tpu.memory_space<vmem>>, %arg14: memref<128x128xbf16, #tpu.memory_space<vmem>>, %arg15: memref<128x256xbf16, #tpu.memory_space<vmem>>, %arg16: memref<1x128xf32, #tpu.memory_space<vmem>>, %arg17: memref<16x128xbf16, #tpu.memory_space<vmem>>, %arg18: memref<2x4x128xf32, #tpu.memory_space<vmem>>, %arg19: memref<2x1x128xf32, #tpu.memory_space<vmem>>, %arg20: memref<16x128xf32, #tpu.memory_space<vmem>>) attributes {dimension_semantics = [#tpu.dimension_semantics<parallel>], iteration_bounds = array<i64: 1>, scalar_prefetch = 0 : i64, scratch_operands = 1 : i64, tpu.core_type = #tpu.core_type<tc>, window_params = [{transform_indices = @transform_0, window_bounds = array<i64: 16, 128>}, {transform_indices = @transform_1, window_bounds = array<i64: 2, 4, 128>}, {transform_indices = @transform_2, window_bounds = array<i64: 2, 1, 128>}, {pipeline_mode = #tpu.pipeline_mode<synchronous>, transform_indices = @transform_3, window_bounds = array<i64: 1, 128>}, {pipeline_mode = #tpu.pipeline_mode<synchronous>, transform_indices = @transform_4, window_bounds = array<i64: 1, 128>}, {pipeline_mode = #tpu.pipeline_mode<synchronous>, transform_indices = @transform_5, window_bounds = array<i64: 128, 512>}, {pipeline_mode = #tpu.pipeline_mode<synchronous>, transform_indices = @transform_6, window_bounds = array<i64: 1, 512>}, {pipeline_mode = #tpu.pipeline_mode<synchronous>, transform_indices = @transform_7, window_bounds = array<i64: 128, 128>}, {pipeline_mode = #tpu.pipeline_mode<synchronous>, transform_indices = @transform_8, window_bounds = array<i64: 1, 128>}, {pipeline_mode = #tpu.pipeline_mode<synchronous>, transform_indices = @transform_9, window_bounds = array<i64: 1, 128>}, {pipeline_mode = #tpu.pipeline_mode<synchronous>, transform_indices = @transform_10, window_bounds = array<i64: 1, 128>}, {pipeline_mode = #tpu.pipeline_mode<synchronous>, transform_indices = @transform_11, window_bounds = array<i64: 1, 128>}, {pipeline_mode = #tpu.pipeline_mode<synchronous>, transform_indices = @transform_12, window_bounds = array<i64: 1, 128>}, {pipeline_mode = #tpu.pipeline_mode<synchronous>, transform_indices = @transform_13, window_bounds = array<i64: 128, 128>}, {pipeline_mode = #tpu.pipeline_mode<synchronous>, transform_indices = @transform_14, window_bounds = array<i64: 128, 256>}, {pipeline_mode = #tpu.pipeline_mode<synchronous>, transform_indices = @transform_15, window_bounds = array<i64: 1, 128>}, {transform_indices = @transform_16, window_bounds = array<i64: 16, 128>}, {transform_indices = @transform_17, window_bounds = array<i64: 2, 4, 128>}, {transform_indices = @transform_18, window_bounds = array<i64: 2, 1, 128>}]} {
    %c0 = arith.constant 0 : index
    %c0_0 = arith.constant 0 : index
    %0 = vector.load %arg1[%c0, %c0_0] : memref<16x128xbf16, #tpu.memory_space<vmem>>, vector<16x128xbf16>
    %1 = arith.extf %0 : vector<16x128xbf16> to vector<16x128xf32>
    %2 = tpu.iota {dimensions = array<i32: 1>} : vector<1x128xi32>
    %c32_i32 = arith.constant 32 : i32
    %3 = vector.broadcast %c32_i32 : i32 to vector<1x128xi32>
    %4 = arith.cmpi slt, %2, %3 : vector<1x128xi32>
    %c0_1 = arith.constant 0 : index
    %c0_2 = arith.constant 0 : index
    %5 = vector.load %arg4[%c0_1, %c0_2] : memref<1x128xf32, #tpu.memory_space<vmem>>, vector<1x128xf32>
    %c0_3 = arith.constant 0 : index
    %c0_4 = arith.constant 0 : index
    %6 = vector.load %arg5[%c0_3, %c0_4] : memref<1x128xf32, #tpu.memory_space<vmem>>, vector<1x128xf32>
    %cst = arith.constant dense<0.000000e+00> : vector<16xf32>
    %7 = vector.multi_reduction <add>, %1, %cst [1] : vector<16x128xf32> to vector<16xf32>
    %8 = vector.shape_cast %7 : vector<16xf32> to vector<16x1xf32>
    %cst_5 = arith.constant 3.125000e-02 : f32
    %9 = vector.broadcast %cst_5 : f32 to vector<16x1xf32>
    %10 = arith.mulf %8, %9 : vector<16x1xf32>
    %11 = vector.broadcast %10 : vector<16x1xf32> to vector<16x128xf32>
    %12 = arith.subf %1, %11 : vector<16x128xf32>
    %cst_6 = arith.constant 0.000000e+00 : f32
    %13 = vector.shape_cast %4 : vector<1x128xi1> to vector<1x128xi1>
    %14 = vector.broadcast %13 : vector<1x128xi1> to vector<16x128xi1>
    %15 = vector.broadcast %cst_6 : f32 to vector<16x128xf32>
    %16 = arith.select %14, %12, %15 : vector<16x128xi1>, vector<16x128xf32>
    %17 = arith.mulf %16, %16 : vector<16x128xf32>
    %cst_7 = arith.constant dense<0.000000e+00> : vector<16xf32>
    %18 = vector.multi_reduction <add>, %17, %cst_7 [1] : vector<16x128xf32> to vector<16xf32>
    %19 = vector.shape_cast %18 : vector<16xf32> to vector<16x1xf32>
    %cst_8 = arith.constant 3.125000e-02 : f32
    %20 = vector.broadcast %cst_8 : f32 to vector<16x1xf32>
    %21 = arith.mulf %19, %20 : vector<16x1xf32>
    %cst_9 = arith.constant 9.99999974E-6 : f32
    %22 = vector.broadcast %cst_9 : f32 to vector<16x1xf32>
    %23 = arith.addf %21, %22 : vector<16x1xf32>
    %24 = math.rsqrt %23 : vector<16x1xf32>
    %25 = vector.broadcast %24 : vector<16x1xf32> to vector<16x128xf32>
    %26 = arith.mulf %16, %25 : vector<16x128xf32>
    %27 = vector.broadcast %5 : vector<1x128xf32> to vector<16x128xf32>
    %28 = arith.mulf %26, %27 : vector<16x128xf32>
    %29 = vector.broadcast %6 : vector<1x128xf32> to vector<16x128xf32>
    %30 = arith.addf %28, %29 : vector<16x128xf32>
    %31 = arith.truncf %30 : vector<16x128xf32> to vector<16x128xbf16>
    %c0_10 = arith.constant 0 : index
    %c0_11 = arith.constant 0 : index
    %32 = vector.load %arg6[%c0_10, %c0_11] : memref<128x512xbf16, #tpu.memory_space<vmem>>, vector<128x512xbf16>
    %cst_12 = arith.constant dense<0.000000e+00> : vector<16x512xf32>
    %33 = tpu.matmul %31, %32, %cst_12 {dimension_numbers = #tpu.dot_dimension_numbers<[1], [0], [0], [1], [0, 0, 1, 1], [], []>} : vector<16x128xbf16>, vector<128x512xbf16>, vector<16x512xf32> -> vector<16x512xf32>
    %c0_13 = arith.constant 0 : index
    %c0_14 = arith.constant 0 : index
    %34 = vector.load %arg7[%c0_13, %c0_14] : memref<1x512xf32, #tpu.memory_space<vmem>>, vector<1x512xf32>
    %35 = vector.broadcast %34 : vector<1x512xf32> to vector<16x512xf32>
    %36 = arith.addf %33, %35 : vector<16x512xf32>
    %37 = vector.extract_strided_slice %36 {offsets = [0, 0], sizes = [16, 128], strides = [1, 1]} : vector<16x512xf32> to vector<16x128xf32>
    %38 = vector.extract_strided_slice %36 {offsets = [0, 128], sizes = [16, 128], strides = [1, 1]} : vector<16x512xf32> to vector<16x128xf32>
    %39 = vector.extract_strided_slice %36 {offsets = [0, 256], sizes = [16, 128], strides = [1, 1]} : vector<16x512xf32> to vector<16x128xf32>
    %40 = arith.negf %39 : vector<16x128xf32>
    %41 = math.exp %40 : vector<16x128xf32>
    %cst_15 = arith.constant 1.000000e+00 : f32
    %42 = vector.broadcast %cst_15 : f32 to vector<16x128xf32>
    %43 = arith.addf %42, %41 : vector<16x128xf32>
    %44 = arith.divf %42, %43 : vector<16x128xf32>
    %45 = vector.extract_strided_slice %36 {offsets = [0, 384], sizes = [16, 128], strides = [1, 1]} : vector<16x512xf32> to vector<16x128xf32>
    %cst_16 = arith.constant dense<0xFF800000> : vector<16xf32>
    %46 = vector.multi_reduction <maximumf>, %45, %cst_16 [1] : vector<16x128xf32> to vector<16xf32>
    %47 = vector.shape_cast %46 : vector<16xf32> to vector<16x1xf32>
    %48 = vector.broadcast %47 : vector<16x1xf32> to vector<16x128xf32>
    %49 = arith.subf %45, %48 : vector<16x128xf32>
    %50 = math.exp %49 : vector<16x128xf32>
    %cst_17 = arith.constant dense<0.000000e+00> : vector<16xf32>
    %51 = vector.multi_reduction <add>, %50, %cst_17 [1] : vector<16x128xf32> to vector<16xf32>
    %52 = vector.shape_cast %51 : vector<16xf32> to vector<16x1xf32>
    %53 = tpu.reciprocal %52 {approx = true} : vector<16x1xf32> -> vector<16x1xf32>
    %54 = vector.broadcast %53 : vector<16x1xf32> to vector<16x128xf32>
    %55 = arith.mulf %50, %54 : vector<16x128xf32>
    %56 = arith.mulf %38, %37 : vector<16x128xf32>
    %57 = vector.shape_cast %56 : vector<16x128xf32> to vector<2x8x128xf32>
    %58 = vector.shape_cast %55 : vector<16x128xf32> to vector<2x8x128xf32>
    %c0_18 = arith.constant 0 : index
    %c0_19 = arith.constant 0 : index
    %c0_20 = arith.constant 0 : index
    %59 = vector.load %arg2[%c0_18, %c0_19, %c0_20] : memref<2x4x128xf32, #tpu.memory_space<vmem>>, vector<2x4x128xf32>
    %60 = vector.extract_strided_slice %58 {offsets = [0, 0, 0], sizes = [2, 8, 1], strides = [1, 1, 1]} : vector<2x8x128xf32> to vector<2x8x1xf32>
    %61 = vector.extract_strided_slice %59 {offsets = [0, 0, 0], sizes = [2, 1, 128], strides = [1, 1, 1]} : vector<2x4x128xf32> to vector<2x1x128xf32>
    %62 = vector.broadcast %60 : vector<2x8x1xf32> to vector<2x8x128xf32>
    %63 = vector.broadcast %61 : vector<2x1x128xf32> to vector<2x8x128xf32>
    %64 = arith.mulf %62, %63 : vector<2x8x128xf32>
    %65 = arith.addf %57, %64 : vector<2x8x128xf32>
    %66 = vector.extract_strided_slice %58 {offsets = [0, 0, 1], sizes = [2, 8, 1], strides = [1, 1, 1]} : vector<2x8x128xf32> to vector<2x8x1xf32>
    %67 = vector.extract_strided_slice %59 {offsets = [0, 1, 0], sizes = [2, 1, 128], strides = [1, 1, 1]} : vector<2x4x128xf32> to vector<2x1x128xf32>
    %68 = vector.broadcast %66 : vector<2x8x1xf32> to vector<2x8x128xf32>
    %69 = vector.broadcast %67 : vector<2x1x128xf32> to vector<2x8x128xf32>
    %70 = arith.mulf %68, %69 : vector<2x8x128xf32>
    %71 = arith.addf %65, %70 : vector<2x8x128xf32>
    %72 = vector.extract_strided_slice %58 {offsets = [0, 0, 2], sizes = [2, 8, 1], strides = [1, 1, 1]} : vector<2x8x128xf32> to vector<2x8x1xf32>
    %73 = vector.extract_strided_slice %59 {offsets = [0, 2, 0], sizes = [2, 1, 128], strides = [1, 1, 1]} : vector<2x4x128xf32> to vector<2x1x128xf32>
    %74 = vector.broadcast %72 : vector<2x8x1xf32> to vector<2x8x128xf32>
    %75 = vector.broadcast %73 : vector<2x1x128xf32> to vector<2x8x128xf32>
    %76 = arith.mulf %74, %75 : vector<2x8x128xf32>
    %77 = arith.addf %71, %76 : vector<2x8x128xf32>
    %78 = vector.extract_strided_slice %58 {offsets = [0, 0, 3], sizes = [2, 8, 1], strides = [1, 1, 1]} : vector<2x8x128xf32> to vector<2x8x1xf32>
    %79 = vector.extract_strided_slice %59 {offsets = [0, 3, 0], sizes = [2, 1, 128], strides = [1, 1, 1]} : vector<2x4x128xf32> to vector<2x1x128xf32>
    %80 = vector.broadcast %78 : vector<2x8x1xf32> to vector<2x8x128xf32>
    %81 = vector.broadcast %79 : vector<2x1x128xf32> to vector<2x8x128xf32>
    %82 = arith.mulf %80, %81 : vector<2x8x128xf32>
    %83 = arith.addf %77, %82 : vector<2x8x128xf32>
    %84 = vector.shape_cast %83 : vector<2x8x128xf32> to vector<16x128xf32>
    %85 = arith.mulf %44, %84 : vector<16x128xf32>
    %86 = arith.truncf %85 : vector<16x128xf32> to vector<16x128xbf16>
    %c0_21 = arith.constant 0 : index
    %c0_22 = arith.constant 0 : index
    %87 = vector.load %arg8[%c0_21, %c0_22] : memref<128x128xbf16, #tpu.memory_space<vmem>>, vector<128x128xbf16>
    %cst_23 = arith.constant dense<0.000000e+00> : vector<16x128xf32>
    %88 = tpu.matmul %86, %87, %cst_23 {dimension_numbers = #tpu.dot_dimension_numbers<[1], [0], [0], [1], [0, 0, 1, 1], [], []>} : vector<16x128xbf16>, vector<128x128xbf16>, vector<16x128xf32> -> vector<16x128xf32>
    %89 = vector.extract_strided_slice %57 {offsets = [0, 7, 0], sizes = [2, 1, 128], strides = [1, 1, 1]} : vector<2x8x128xf32> to vector<2x1x128xf32>
    %90 = vector.broadcast %89 : vector<2x1x128xf32> to vector<2x4x128xf32>
    %91 = arith.addf %59, %90 : vector<2x4x128xf32>
    %c0_24 = arith.constant 0 : index
    %c0_25 = arith.constant 0 : index
    %c0_26 = arith.constant 0 : index
    %92 = vector.load %arg18[%c0_24, %c0_25, %c0_26] : memref<2x4x128xf32, #tpu.memory_space<vmem>>, vector<2x4x128xf32>
    tpu.vector_store %arg18[%c0_24, %c0_25, %c0_26], %91 {strides = array<i32>} : memref<2x4x128xf32, #tpu.memory_space<vmem>>, vector<2x4x128xf32>,
    %c0_27 = arith.constant 0 : index
    %c0_28 = arith.constant 0 : index
    %93 = vector.load %arg9[%c0_27, %c0_28] : memref<1x128xf32, #tpu.memory_space<vmem>>, vector<1x128xf32>
    %94 = vector.broadcast %93 : vector<1x128xf32> to vector<16x128xf32>
    %95 = arith.mulf %88, %94 : vector<16x128xf32>
    %96 = arith.addf %1, %95 : vector<16x128xf32>
    %c0_29 = arith.constant 0 : index
    %c0_30 = arith.constant 0 : index
    %97 = vector.load %arg10[%c0_29, %c0_30] : memref<1x128xf32, #tpu.memory_space<vmem>>, vector<1x128xf32>
    %c0_31 = arith.constant 0 : index
    %c0_32 = arith.constant 0 : index
    %98 = vector.load %arg11[%c0_31, %c0_32] : memref<1x128xf32, #tpu.memory_space<vmem>>, vector<1x128xf32>
    %cst_33 = arith.constant dense<0.000000e+00> : vector<16xf32>
    %99 = vector.multi_reduction <add>, %96, %cst_33 [1] : vector<16x128xf32> to vector<16xf32>
    %100 = vector.shape_cast %99 : vector<16xf32> to vector<16x1xf32>
    %cst_34 = arith.constant 3.125000e-02 : f32
    %101 = vector.broadcast %cst_34 : f32 to vector<16x1xf32>
    %102 = arith.mulf %100, %101 : vector<16x1xf32>
    %103 = vector.broadcast %102 : vector<16x1xf32> to vector<16x128xf32>
    %104 = arith.subf %96, %103 : vector<16x128xf32>
    %cst_35 = arith.constant 0.000000e+00 : f32
    %105 = vector.shape_cast %4 : vector<1x128xi1> to vector<1x128xi1>
    %106 = vector.broadcast %105 : vector<1x128xi1> to vector<16x128xi1>
    %107 = vector.broadcast %cst_35 : f32 to vector<16x128xf32>
    %108 = arith.select %106, %104, %107 : vector<16x128xi1>, vector<16x128xf32>
    %109 = arith.mulf %108, %108 : vector<16x128xf32>
    %cst_36 = arith.constant dense<0.000000e+00> : vector<16xf32>
    %110 = vector.multi_reduction <add>, %109, %cst_36 [1] : vector<16x128xf32> to vector<16xf32>
    %111 = vector.shape_cast %110 : vector<16xf32> to vector<16x1xf32>
    %cst_37 = arith.constant 3.125000e-02 : f32
    %112 = vector.broadcast %cst_37 : f32 to vector<16x1xf32>
    %113 = arith.mulf %111, %112 : vector<16x1xf32>
    %cst_38 = arith.constant 9.99999974E-6 : f32
    %114 = vector.broadcast %cst_38 : f32 to vector<16x1xf32>
    %115 = arith.addf %113, %114 : vector<16x1xf32>
    %116 = math.rsqrt %115 : vector<16x1xf32>
    %117 = vector.broadcast %116 : vector<16x1xf32> to vector<16x128xf32>
    %118 = arith.mulf %108, %117 : vector<16x128xf32>
    %119 = vector.broadcast %97 : vector<1x128xf32> to vector<16x128xf32>
    %120 = arith.mulf %118, %119 : vector<16x128xf32>
    %121 = vector.broadcast %98 : vector<1x128xf32> to vector<16x128xf32>
    %122 = arith.addf %120, %121 : vector<16x128xf32>
    %c1_i32 = arith.constant 1 : i32
    %123 = tpu.dynamic_rotate %122 by %c1_i32 dim 0 : vector<16x128xf32>, i32 -> vector<16x128xf32>
    %c0_39 = arith.constant 0 : index
    %c0_40 = arith.constant 0 : index
    %124 = vector.load %arg20[%c0_39, %c0_40] : memref<16x128xf32, #tpu.memory_space<vmem>>, vector<16x128xf32>
    tpu.vector_store %arg20[%c0_39, %c0_40], %123 {strides = array<i32>} : memref<16x128xf32, #tpu.memory_space<vmem>>, vector<16x128xf32>,
    %c0_41 = arith.constant 0 : index
    %c0_42 = arith.constant 0 : index
    %c0_43 = arith.constant 0 : index
    %125 = vector.load %arg3[%c0_41, %c0_42, %c0_43] : memref<2x1x128xf32, #tpu.memory_space<vmem>>, vector<1x1x128xf32>
    %126 = vector.shape_cast %125 : vector<1x1x128xf32> to vector<1x128xf32>
    %c0_44 = arith.constant 0 : index
    %c0_45 = arith.constant 0 : index
    %127 = vector.load %arg20[%c0_44, %c0_45] : memref<16x128xf32, #tpu.memory_space<vmem>>, vector<1x128xf32>
    tpu.vector_store %arg20[%c0_44, %c0_45], %126 {strides = array<i32>} : memref<16x128xf32, #tpu.memory_space<vmem>>, vector<1x128xf32>,
    %c1 = arith.constant 1 : index
    %c0_46 = arith.constant 0 : index
    %c0_47 = arith.constant 0 : index
    %128 = vector.load %arg3[%c1, %c0_46, %c0_47] : memref<2x1x128xf32, #tpu.memory_space<vmem>>, vector<1x1x128xf32>
    %129 = vector.shape_cast %128 : vector<1x1x128xf32> to vector<1x128xf32>
    %c8 = arith.constant 8 : index
    %c0_48 = arith.constant 0 : index
    %130 = vector.load %arg20[%c8, %c0_48] : memref<16x128xf32, #tpu.memory_space<vmem>>, vector<1x128xf32>
    tpu.vector_store %arg20[%c8, %c0_48], %129 {strides = array<i32>} : memref<16x128xf32, #tpu.memory_space<vmem>>, vector<1x128xf32>,
    %c0_49 = arith.constant 0 : index
    %c0_50 = arith.constant 0 : index
    %131 = vector.load %arg20[%c0_49, %c0_50] : memref<16x128xf32, #tpu.memory_space<vmem>>, vector<16x128xf32>
    %c0_51 = arith.constant 0 : index
    %c0_52 = arith.constant 0 : index
    %132 = vector.load %arg12[%c0_51, %c0_52] : memref<1x128xf32, #tpu.memory_space<vmem>>, vector<1x128xf32>
    %133 = vector.broadcast %132 : vector<1x128xf32> to vector<16x128xf32>
    %134 = arith.mulf %122, %133 : vector<16x128xf32>
    %c0_53 = arith.constant 0 : index
    %c0_54 = arith.constant 0 : index
    %135 = vector.load %arg13[%c0_53, %c0_54] : memref<1x128xf32, #tpu.memory_space<vmem>>, vector<1x128xf32>
    %136 = vector.broadcast %135 : vector<1x128xf32> to vector<16x128xf32>
    %137 = arith.mulf %131, %136 : vector<16x128xf32>
    %138 = arith.addf %134, %137 : vector<16x128xf32>
    %139 = arith.truncf %138 : vector<16x128xf32> to vector<16x128xbf16>
    %c0_55 = arith.constant 0 : index
    %c0_56 = arith.constant 0 : index
    %140 = vector.load %arg14[%c0_55, %c0_56] : memref<128x128xbf16, #tpu.memory_space<vmem>>, vector<128x128xbf16>
    %cst_57 = arith.constant dense<0.000000e+00> : vector<16x128xf32>
    %141 = tpu.matmul %139, %140, %cst_57 {dimension_numbers = #tpu.dot_dimension_numbers<[1], [0], [0], [1], [0, 0, 1, 1], [], []>} : vector<16x128xbf16>, vector<128x128xbf16>, vector<16x128xf32> -> vector<16x128xf32>
    %cst_58 = arith.constant 0.000000e+00 : f32
    %142 = vector.broadcast %cst_58 : f32 to vector<16x128xf32>
    %143 = arith.maximumf %141, %142 : vector<16x128xf32>
    %144 = arith.mulf %143, %143 : vector<16x128xf32>
    %145 = arith.truncf %144 : vector<16x128xf32> to vector<16x128xbf16>
    %c0_59 = arith.constant 0 : index
    %c0_60 = arith.constant 0 : index
    %146 = vector.load %arg15[%c0_59, %c0_60] : memref<128x256xbf16, #tpu.memory_space<vmem>>, vector<128x256xbf16>
    %cst_61 = arith.constant dense<0.000000e+00> : vector<16x256xf32>
    %147 = tpu.matmul %145, %146, %cst_61 {dimension_numbers = #tpu.dot_dimension_numbers<[1], [0], [0], [1], [0, 0, 1, 1], [], []>} : vector<16x128xbf16>, vector<128x256xbf16>, vector<16x256xf32> -> vector<16x256xf32>
    %148 = vector.extract_strided_slice %147 {offsets = [0, 0], sizes = [16, 128], strides = [1, 1]} : vector<16x256xf32> to vector<16x128xf32>
    %149 = vector.extract_strided_slice %147 {offsets = [0, 128], sizes = [16, 128], strides = [1, 1]} : vector<16x256xf32> to vector<16x128xf32>
    %150 = arith.negf %149 : vector<16x128xf32>
    %151 = math.exp %150 : vector<16x128xf32>
    %cst_62 = arith.constant 1.000000e+00 : f32
    %152 = vector.broadcast %cst_62 : f32 to vector<16x128xf32>
    %153 = arith.addf %152, %151 : vector<16x128xf32>
    %154 = arith.divf %152, %153 : vector<16x128xf32>
    %155 = arith.mulf %148, %154 : vector<16x128xf32>
    %cst_63 = arith.constant 1.000000e+00 : f32
    %156 = vector.broadcast %cst_63 : f32 to vector<16x128xf32>
    %157 = arith.mulf %155, %156 : vector<16x128xf32>
    %158 = vector.shape_cast %122 : vector<16x128xf32> to vector<2x8x128xf32>
    %159 = vector.extract_strided_slice %158 {offsets = [0, 7, 0], sizes = [2, 1, 128], strides = [1, 1, 1]} : vector<2x8x128xf32> to vector<2x1x128xf32>
    %c0_64 = arith.constant 0 : index
    %c0_65 = arith.constant 0 : index
    %c0_66 = arith.constant 0 : index
    %160 = vector.load %arg19[%c0_64, %c0_65, %c0_66] : memref<2x1x128xf32, #tpu.memory_space<vmem>>, vector<2x1x128xf32>
    tpu.vector_store %arg19[%c0_64, %c0_65, %c0_66], %159 {strides = array<i32>} : memref<2x1x128xf32, #tpu.memory_space<vmem>>, vector<2x1x128xf32>,
    %c0_67 = arith.constant 0 : index
    %c0_68 = arith.constant 0 : index
    %161 = vector.load %arg16[%c0_67, %c0_68] : memref<1x128xf32, #tpu.memory_space<vmem>>, vector<1x128xf32>
    %162 = vector.broadcast %161 : vector<1x128xf32> to vector<16x128xf32>
    %163 = arith.mulf %157, %162 : vector<16x128xf32>
    %164 = arith.addf %96, %163 : vector<16x128xf32>
    %165 = arith.truncf %164 : vector<16x128xf32> to vector<16x128xbf16>
    %c0_69 = arith.constant 0 : index
    %c0_70 = arith.constant 0 : index
    %166 = vector.load %arg17[%c0_69, %c0_70] : memref<16x128xbf16, #tpu.memory_space<vmem>>, vector<16x128xbf16>
    tpu.vector_store %arg17[%c0_69, %c0_70], %165 {strides = array<i32>} : memref<16x128xbf16, #tpu.memory_space<vmem>>, vector<16x128xbf16>,
    return
  }
  func.func @transform_0(%arg0: i32) -> (i32, i32) {
    %c0_i32 = arith.constant 0 : i32
    %c0_i32_0 = arith.constant 0 : i32
    return %arg0, %c0_i32 : i32, i32
  }
  func.func @transform_1(%arg0: i32) -> (i32, i32, i32) {
    %c0_i32 = arith.constant 0 : i32
    %c0_i32_0 = arith.constant 0 : i32
    %c0_i32_1 = arith.constant 0 : i32
    return %arg0, %c0_i32, %c0_i32_0 : i32, i32, i32
  }
  func.func @transform_2(%arg0: i32) -> (i32, i32, i32) {
    %c0_i32 = arith.constant 0 : i32
    %c0_i32_0 = arith.constant 0 : i32
    %c0_i32_1 = arith.constant 0 : i32
    return %arg0, %c0_i32, %c0_i32_0 : i32, i32, i32
  }
  func.func @transform_3(%arg0: i32) -> (i32, i32) {
    %c0_i32 = arith.constant 0 : i32
    %c0_i32_0 = arith.constant 0 : i32
    %c0_i32_1 = arith.constant 0 : i32
    return %c0_i32, %c0_i32_0 : i32, i32
  }
  func.func @transform_4(%arg0: i32) -> (i32, i32) {
    %c0_i32 = arith.constant 0 : i32
    %c0_i32_0 = arith.constant 0 : i32
    %c0_i32_1 = arith.constant 0 : i32
    return %c0_i32, %c0_i32_0 : i32, i32
  }
  func.func @transform_5(%arg0: i32) -> (i32, i32) {
    %c0_i32 = arith.constant 0 : i32
    %c0_i32_0 = arith.constant 0 : i32
    %c0_i32_1 = arith.constant 0 : i32
    return %c0_i32, %c0_i32_0 : i32, i32
  }
  func.func @transform_6(%arg0: i32) -> (i32, i32) {
    %c0_i32 = arith.constant 0 : i32
    %c0_i32_0 = arith.constant 0 : i32
    %c0_i32_1 = arith.constant 0 : i32
    return %c0_i32, %c0_i32_0 : i32, i32
  }
  func.func @transform_7(%arg0: i32) -> (i32, i32) {
    %c0_i32 = arith.constant 0 : i32
    %c0_i32_0 = arith.constant 0 : i32
    %c0_i32_1 = arith.constant 0 : i32
    return %c0_i32, %c0_i32_0 : i32, i32
  }
  func.func @transform_8(%arg0: i32) -> (i32, i32) {
    %c0_i32 = arith.constant 0 : i32
    %c0_i32_0 = arith.constant 0 : i32
    %c0_i32_1 = arith.constant 0 : i32
    return %c0_i32, %c0_i32_0 : i32, i32
  }
  func.func @transform_9(%arg0: i32) -> (i32, i32) {
    %c0_i32 = arith.constant 0 : i32
    %c0_i32_0 = arith.constant 0 : i32
    %c0_i32_1 = arith.constant 0 : i32
    return %c0_i32, %c0_i32_0 : i32, i32
  }
  func.func @transform_10(%arg0: i32) -> (i32, i32) {
    %c0_i32 = arith.constant 0 : i32
    %c0_i32_0 = arith.constant 0 : i32
    %c0_i32_1 = arith.constant 0 : i32
    return %c0_i32, %c0_i32_0 : i32, i32
  }
  func.func @transform_11(%arg0: i32) -> (i32, i32) {
    %c0_i32 = arith.constant 0 : i32
    %c0_i32_0 = arith.constant 0 : i32
    %c0_i32_1 = arith.constant 0 : i32
    return %c0_i32, %c0_i32_0 : i32, i32
  }
  func.func @transform_12(%arg0: i32) -> (i32, i32) {
    %c0_i32 = arith.constant 0 : i32
    %c0_i32_0 = arith.constant 0 : i32
    %c0_i32_1 = arith.constant 0 : i32
    return %c0_i32, %c0_i32_0 : i32, i32
  }
  func.func @transform_13(%arg0: i32) -> (i32, i32) {
    %c0_i32 = arith.constant 0 : i32
    %c0_i32_0 = arith.constant 0 : i32
    %c0_i32_1 = arith.constant 0 : i32
    return %c0_i32, %c0_i32_0 : i32, i32
  }
  func.func @transform_14(%arg0: i32) -> (i32, i32) {
    %c0_i32 = arith.constant 0 : i32
    %c0_i32_0 = arith.constant 0 : i32
    %c0_i32_1 = arith.constant 0 : i32
    return %c0_i32, %c0_i32_0 : i32, i32
  }
  func.func @transform_15(%arg0: i32) -> (i32, i32) {
    %c0_i32 = arith.constant 0 : i32
    %c0_i32_0 = arith.constant 0 : i32
    %c0_i32_1 = arith.constant 0 : i32
    return %c0_i32, %c0_i32_0 : i32, i32
  }
  func.func @transform_16(%arg0: i32) -> (i32, i32) {
    %c0_i32 = arith.constant 0 : i32
    %c0_i32_0 = arith.constant 0 : i32
    return %arg0, %c0_i32 : i32, i32
  }
  func.func @transform_17(%arg0: i32) -> (i32, i32, i32) {
    %c0_i32 = arith.constant 0 : i32
    %c0_i32_0 = arith.constant 0 : i32
    %c0_i32_1 = arith.constant 0 : i32
    return %arg0, %c0_i32, %c0_i32_0 : i32, i32, i32
  }
  func.func @transform_18(%arg0: i32) -> (i32, i32, i32) {
    %c0_i32 = arith.constant 0 : i32
    %c0_i32_0 = arith.constant 0 : i32
    %c0_i32_1 = arith.constant 0 : i32
    return %arg0, %c0_i32, %c0_i32_0 : i32, i32, i32
  }
}

</mosaic_0001>

<bundles_post_ra>
// kernel: tpu_custom_call.1
= control target key start
LH: loop header
LB: loop body
LE: loop exit
PB: predicated region body
PF: predicated region fallthrough
CT: control target
= control target key end

     0   :  { %s2011_s0 = inlined_call_operand.hbm [shape: bf16[16,128], index: 0, kind: input, shape index: {}]   ;;  %s2012_s1 = inlined_call_operand.hbm [shape: f32[2,4,128], index: 1, kind: input, shape index: {}]   ;;  %s2013_s2 = inlined_call_operand.vmem [shape: f32[2,1,128], index: 2, kind: input, shape index: {}]   ;;  %s2014_s3 = inlined_call_operand.vmem [shape: f32[1,128], index: 3, kind: input, shape index: {}]   ;;  %s2015_s4 = inlined_call_operand.hbm [shape: f32[1,128], index: 4, kind: input, shape index: {}]   ;;  %s2016_s5 = inlined_call_operand.hbm [shape: bf16[128,512], index: 5, kind: input, shape index: {}]   ;;  %s2017_s6 = inlined_call_operand.vmem [shape: f32[1,512], index: 6, kind: input, shape index: {}]   ;;  %s2018_s7 = inlined_call_operand.hbm [shape: bf16[128,128], index: 7, kind: input, shape index: {}]   ;;  %s2019_s8 = inlined_call_operand.vmem [shape: f32[1,128], index: 8, kind: input, shape index: {}]   ;;  %s2020_s9 = inlined_call_operand.vmem [shape: f32[1,128], index: 9, kind: input, shape index: {}]   ;;  %s2021_s10 = inlined_call_operand.vmem [shape: f32[1,128], index: 10, kind: input, shape index: {}]   ;;  %s2022_s11 = inlined_call_operand.vmem [shape: f32[1,128], index: 11, kind: input, shape index: {}]   ;;  %s2023_s12 = inlined_call_operand.vmem [shape: f32[1,128], index: 12, kind: input, shape index: {}]   ;;  %s2024_s13 = inlined_call_operand.hbm [shape: bf16[128,128], index: 13, kind: input, shape index: {}]   ;;  %s2025_s14 = inlined_call_operand.hbm [shape: bf16[128,256], index: 14, kind: input, shape index: {}]   ;;  %s2026_s15 = inlined_call_operand.vmem [shape: f32[1,128], index: 15, kind: input, shape index: {}]   ;;  %s2027_s16 = inlined_call_operand.hbm [shape: bf16[16,128], index: 16, kind: output, shape index: {0}]   ;;  %s2028_s17 = inlined_call_operand.hbm [shape: f32[2,4,128], index: 17, kind: output, shape index: {1}]   ;;  %s2029_s18 = inlined_call_operand.hbm [shape: f32[2,1,128], index: 18, kind: output, shape index: {2}]  }
   0x1   :  { %2031 = sst [smem:[#allocation25_spill]] %s2011_s0 }
   0x2   :  { %2032 = sst [smem:[#allocation26_spill]] %s2012_s1 }
   0x3   :  { %2033 = sst [smem:[#allocation27_spill]] %s2013_s2 }
   0x4   :  { %2034 = sst [smem:[#allocation28_spill]] %s2027_s16 }
   0x5   :  { %24 = vsyncpa [#allocation4], 0 }
   0x6   :  { %25 = vsyncpa [#allocation7], 0 }
   0x7   :  { %26 = vsyncpa [#allocation10], 0 }
   0x8   :  { %27 = vsyncpa [#allocation13], 0 }
   0x9   :  { %28 = vsyncpa [#allocation5], 0 }
   0xa   :  { %29 = vsyncpa [#allocation17], 0  ;;  %s1679_s27 = smov [#allocation6]   ;;  %s1680_s29 = smov [#allocation9]  }
   0xb   :  { %s47_s28 = sshll.u32 %s1679_s27, 4  ;;  %s73_s30 = sshll.u32 %s1680_s29, 4  ;;  %s48_s28 = int_to_ptr.vmem [resolvable:$true] %s47_s28  ;;  %s74_s30 = int_to_ptr.vmem [resolvable:$true] %s73_s30 }
   0xc   :  { %s1475_s0 = scalar_lea.vmem %s48_s28, 128  ;;  %p1480_p1 = scmp.lt.s32.totalorder %s48_s28, %s48_s28 }
   0xd   :  { %p1476_p0 = scmp.ne.s32.totalorder %s48_s28, %s1475_s0  ;;  %p1481_p2 = scmp.lt.s32.totalorder %s1475_s0, %s1475_s0 }
   0xf   :  { %p1482_p3 = por %p1481_p2, %p1480_p1 }
  0x11   :  { %p1483_p4 = pnand %p1482_p3, %p1476_p0 }
  0x13   :  { %1486 = shalt.err (!%p1483_p4)
}
  0x14   :  { %s1681_s19 = smov 64   ;;  %s1682_s1 = smov 4  }
  0x15   :  { %s2035_s22 = sld [smem:[#allocation26_spill]]  ;;  %s1495_s2 = scalar_lea.vmem %s74_s30, 4096 }
  0x16   :  { %p1496_p5 = scmp.ne.s32.totalorder %s74_s30, %s1495_s2  ;;  %p1500_p6 = scmp.lt.s32.totalorder %s74_s30, %s74_s30 }
  0x17   :  { %p1501_p7 = scmp.lt.s32.totalorder %s1495_s2, %s1495_s2 }
  0x19   :  { %p1502_p8 = por %p1501_p7, %p1500_p6 }
  0x1b   :  { %53 = dma.hbm_to_vmem [thread:$0]  %s2035_s22, 128, %s48_s28, [#allocation7], %s1681_s19, %s1681_s19, %s1682_s1  }
  0x1c   :  { %p1503_p9 = pnand %p1502_p8, %p1496_p5 }
  0x1e   :  { %1506 = shalt.err (!%p1503_p9)
}
  0x1f   :  { %s1683_s23 = smov 256   ;;  %s1684_s24 = smov 16  }
  0x20   :  { %79 = dma.hbm_to_vmem [thread:$0]  %s2016_s5, 4096, %s74_s30, [#allocation10], %s1683_s23, %s1683_s23, %s1684_s24  }
  0x21   :  { %s1685_s27 = smov [#allocation12]   ;;  %s1686_s0 = smov [#allocation3]  }
  0x22   :  { %s109_s29 = sshll.u32 %s1685_s27, 4  ;;  %s35_s16 = sshll.u32 %s1686_s0, 4  ;;  %s110_s29 = int_to_ptr.vmem [resolvable:$true] %s109_s29  ;;  %s36_s16 = int_to_ptr.vmem [resolvable:$true] %s35_s16 }
  0x23   :  { %s1515_s28 = scalar_lea.vmem %s110_s29, 1024  ;;  %p1520_p11 = scmp.lt.s32.totalorder %s110_s29, %s110_s29 }
  0x24   :  { %p1516_p10 = scmp.ne.s32.totalorder %s110_s29, %s1515_s28  ;;  %p1521_p12 = scmp.lt.s32.totalorder %s1515_s28, %s1515_s28 }
  0x26   :  { %p1522_p13 = por %p1521_p12, %p1520_p11 }
  0x28   :  { %p1523_p0 = pnand %p1522_p13, %p1516_p10 }
  0x2a   :  { %1526 = shalt.err (!%p1523_p0)
}
  0x2b   :  { %115 = dma.hbm_to_vmem [thread:$0]  %s2024_s13, 1024, %s110_s29, [#allocation13], %s1681_s19, %s1681_s19, %s1682_s1  }
  0x2c   :  { %s1535_s5 = scalar_lea.vmem %s36_s16, 128  ;;  %p1540_p2 = scmp.lt.s32.totalorder %s36_s16, %s36_s16 }
  0x2d   :  { %p1536_p1 = scmp.ne.s32.totalorder %s36_s16, %s1535_s5  ;;  %p1541_p3 = scmp.lt.s32.totalorder %s1535_s5, %s1535_s5 }
  0x2f   :  { %p1542_p4 = por %p1541_p3, %p1540_p2 }
  0x31   :  { %p1543_p5 = pnand %p1542_p4, %p1536_p1 }
  0x33   :  { %1546 = shalt.err (!%p1543_p5)
}
  0x34   :  { %s2036_s2 = sld [smem:[#allocation25_spill]]  ;;  %s1687_s23 = smov [#allocation8]  }
  0x35   :  { %s64_s25 = sshll.u32 %s1687_s23, 4  ;;  %s1688_s26 = smov [#allocation11]   ;;  %s65_s25 = int_to_ptr.vmem [resolvable:$true] %s64_s25 }
  0x36   :  { %s87_s27 = sshll.u32 %s1688_s26, 4  ;;  %s1555_s13 = scalar_lea.vmem %s65_s25, 16  ;;  %s88_s27 = int_to_ptr.vmem [resolvable:$true] %s87_s27 }
  0x37   :  { %p1556_p6 = scmp.ne.s32.totalorder %s65_s25, %s1555_s13  ;;  %s1559_s29 = scalar_lea.vmem %s65_s25, 32 }
  0x38   :  { %p1560_p7 = scmp.lt.s32.totalorder %s65_s25, %s65_s25  ;;  %p1561_p8 = scmp.lt.s32.totalorder %s1559_s29, %s1555_s13 }
  0x3a   :  { %41 = dma.hbm_to_vmem [thread:$0]  %s2036_s2, 128, %s36_s16, [#allocation4], %s1681_s19, %s1681_s19, %s1682_s1  }
  0x3b   :  { %p1562_p9 = por %p1561_p8, %p1560_p7 }
  0x3d   :  { %p1563_p10 = pnand %p1562_p9, %p1556_p6 }
  0x3f   :  { %1566 = shalt.err (!%p1563_p10)
}
  0x40   :  { %67 = dma.hbm_to_vmem [thread:$0]  %s2015_s4, 16, %s65_s25, [#allocation7]  }
  0x41   :  { %s1575_s20 = scalar_lea.vmem %s88_s27, 1024  ;;  %p1580_p12 = scmp.lt.s32.totalorder %s88_s27, %s88_s27 }
  0x42   :  { %p1576_p11 = scmp.ne.s32.totalorder %s88_s27, %s1575_s20  ;;  %p1581_p13 = scmp.lt.s32.totalorder %s1575_s20, %s1575_s20 }
  0x44   :  { %p1582_p0 = por %p1581_p13, %p1580_p12 }
  0x46   :  { %p1583_p1 = pnand %p1582_p0, %p1576_p11 }
  0x48   :  { %1586 = shalt.err (!%p1583_p1)
}
  0x49   :  { %93 = dma.hbm_to_vmem [thread:$0]  %s2018_s7, 1024, %s88_s27, [#allocation10], %s1681_s19, %s1681_s19, %s1682_s1  }
  0x4a   :  { %s1689_s5 = smov [#allocation14]  }
  0x4b   :  { %s121_s30 = sshll.u32 %s1689_s5, 4  ;;  %s122_s30 = int_to_ptr.vmem [resolvable:$true] %s121_s30 }
  0x4c   :  { %s1595_s22 = scalar_lea.vmem %s122_s30, 2048  ;;  %p1600_p3 = scmp.lt.s32.totalorder %s122_s30, %s122_s30 }
  0x4d   :  { %p1596_p2 = scmp.ne.s32.totalorder %s122_s30, %s1595_s22  ;;  %p1601_p4 = scmp.lt.s32.totalorder %s1595_s22, %s1595_s22 }
  0x4f   :  { %p1602_p5 = por %p1601_p4, %p1600_p3 }
  0x51   :  { %p1603_p6 = pnand %p1602_p5, %p1596_p2 }
  0x53   :  { %1606 = shalt.err (!%p1603_p6)
}
  0x54   :  { %s1690_s4 = smov 128   ;;  %s1691_s2 = smov 8  }
  0x55   :  { %127 = dma.hbm_to_vmem [thread:$0]  %s2025_s14, 2048, %s122_s30, [#allocation13], %s1690_s4, %s1690_s4, %s1691_s2  }
  0x56   :  { %1667 = dma.done.wait [#allocation4], 128  }
  0x57   :  { %1668 = vsyncadd [#allocation4], 4294967168 }
  0x58   :  { %1669 = dma.done.wait [#allocation7], 144  }
  0x59   :  { %1670 = vsyncadd [#allocation7], 4294967152 }
  0x5a   :  { %1671 = dma.done.wait [#allocation10], 5120  }
  0x5b   :  { %1672 = vsyncadd [#allocation10], 4294962176 }
  0x5c   :  { %1673 = dma.done.wait [#allocation13], 3072  }
  0x5d   :  { %1674 = vsyncadd [#allocation13], 4294964224  ;;  %v1249_v0 = vld [vmem:[#allocation3] sm:$0xff]   ;;  %v1352_v6 = vld [vmem:[#allocation9 + $0xe8] ss:$16 sps:$4 sm:$0xff]   ;;  %v156_v7 = vlaneseq  ;;  %v1692_v41 = vmov 0  }
  0x5e   :  { %v1831_v1 = vunpack.c.l.bf16 %v1249_v0  ;;  %v1834_v2 = vunpack.c.h.bf16 %v1249_v0  ;;  %v1347_v3 = vld [vmem:[#allocation9 + $0xe4] ss:$16 sps:$4 sm:$0xff]   ;;  %v1349_v4 = vld [vmem:[#allocation9 + $0xec] ss:$16 sps:$4 sm:$0xff]   ;;  %v1351_v5 = vld [vmem:[#allocation9 + $0xe0] ss:$16 sps:$4 sm:$0xff]   ;;  %450 = vmatprep.mubr.bf16.mxu0 %v1692_v41  ;;  %493 = vmatprep.mubr.bf16.mxu1 %v1692_v41 }
  0x5f   :  { %418 = vmatprep.subr.bf16.mxu0 %v1347_v3  ;;  %461 = vmatprep.subr.bf16.mxu1 %v1349_v4  ;;  %v1838_v8 = vand.u32 127, %v156_v7  ;;  %v1353_v19 = vld [vmem:[#allocation9 + $0xc4] ss:$16 sps:$4 sm:$0xff]   ;;  %v1355_v20 = vld [vmem:[#allocation9 + $0xcc] ss:$16 sps:$4 sm:$0xff]   ;;  %v1864_v3 = vshrl.u32 %v156_v7, 7 }
  0x60   :  { %161 = vadd.xlane.f32.xlu0 %v1831_v1  ;;  %419 = vmatpush1.bf16.msra.mxu0 %v1351_v5  ;;  %v1357_v21 = vld [vmem:[#allocation9 + $0xc0] ss:$16 sps:$4 sm:$0xff]   ;;  %v1358_v22 = vld [vmem:[#allocation9 + $0xc8] ss:$16 sps:$4 sm:$0xff]   ;;  %v1359_v23 = vld [vmem:[#allocation9 + $0xa4] ss:$16 sps:$4 sm:$0xff]  }
  0x61   :  { %462 = vmatpush1.bf16.msra.mxu1 %v1352_v6  ;;  %vm158_vm0 = vcmp.lt.s32.totalorder %v1838_v8, 32  ;;  %420 = vmatprep.subr.bf16.mxu0 %v1353_v19  ;;  %v1361_v24 = vld [vmem:[#allocation9 + $0xac] ss:$16 sps:$4 sm:$0xff]   ;;  %v1363_v25 = vld [vmem:[#allocation9 + $0xa0] ss:$16 sps:$4 sm:$0xff]   ;;  %v1867_v4 = vsub.s32 0, %v1864_v3 }
  0x62   :  { %463 = vmatprep.subr.bf16.mxu1 %v1355_v20  ;;  %v1364_v26 = vld [vmem:[#allocation9 + $0xa8] ss:$16 sps:$4 sm:$0xff]   ;;  %v1365_v27 = vld [vmem:[#allocation9 + $0x84] ss:$16 sps:$4 sm:$0xff]   ;;  %v1367_v28 = vld [vmem:[#allocation9 + $0x8c] ss:$16 sps:$4 sm:$0xff]   ;;  %1338 = vset.pattern.permute.xlu0 %v1692_v41 }
  0x63   :  { %v1369_v29 = vld [vmem:[#allocation9 + $0x80] ss:$16 sps:$4 sm:$0xff]   ;;  %v1370_v30 = vld [vmem:[#allocation9 + $0x88] ss:$16 sps:$4 sm:$0xff]   ;;  %v1371_v31 = vld [vmem:[#allocation9 + $0x64] ss:$16 sps:$4 sm:$0xff]  }
  0x64   :  { %163 = vadd.xlane.f32.xlu0 %v1834_v2  ;;  %421 = vmatpush1.bf16.msra.mxu0 %v1357_v21  ;;  %v1373_v32 = vld [vmem:[#allocation9 + $0x6c] ss:$16 sps:$4 sm:$0xff]   ;;  %v1375_v33 = vld [vmem:[#allocation9 + $0x60] ss:$16 sps:$4 sm:$0xff]   ;;  %v1376_v34 = vld [vmem:[#allocation9 + $0x68] ss:$16 sps:$4 sm:$0xff]  }
  0x65   :  { %464 = vmatpush1.bf16.msra.mxu1 %v1358_v22  ;;  %422 = vmatprep.subr.bf16.mxu0 %v1359_v23  ;;  %v1377_v35 = vld [vmem:[#allocation9 + $0x44] ss:$16 sps:$4 sm:$0xff]   ;;  %v1379_v36 = vld [vmem:[#allocation9 + $0x4c] ss:$16 sps:$4 sm:$0xff]   ;;  %v1381_v37 = vld [vmem:[#allocation9 + $0x40] ss:$16 sps:$4 sm:$0xff]  }
  0x66   :  { %465 = vmatprep.subr.bf16.mxu1 %v1361_v24  ;;  %v1382_v38 = vld [vmem:[#allocation9 + $0x48] ss:$16 sps:$4 sm:$0xff]   ;;  %v1383_v39 = vld [vmem:[#allocation9 + $0x24] ss:$16 sps:$4 sm:$0xff]   ;;  %v1385_v40 = vld [vmem:[#allocation9 + $0x2c] ss:$16 sps:$4 sm:$0xff]  }
  0x67   :  { %v1387_v42 = vld [vmem:[#allocation9 + $0x20] ss:$16 sps:$4 sm:$0xff]   ;;  %v1388_v43 = vld [vmem:[#allocation9 + $0x28] ss:$16 sps:$4 sm:$0xff]   ;;  %v1389_v44 = vld [vmem:[#allocation9 + $0x4] ss:$16 sps:$4 sm:$0xff]  }
  0x68   :  { %423 = vmatpush1.bf16.msra.mxu0 %v1363_v25  ;;  %v1391_v45 = vld [vmem:[#allocation9 + $0xc] ss:$16 sps:$4 sm:$0xff]   ;;  %v1393_v46 = vld [vmem:[#allocation9] ss:$16 sps:$4 sm:$0xff]   ;;  %v1394_v47 = vld [vmem:[#allocation9 + $0x8] ss:$16 sps:$4 sm:$0xff]  }
  0x69   :  { %466 = vmatpush1.bf16.msra.mxu1 %v1364_v26  ;;  %424 = vmatprep.subr.bf16.mxu0 %v1365_v27  ;;  %v1167_v56 = vld [vmem:[%s2014_s3] ss:$0 sm:$0xff]  ;;  %v1870_v5 = vsub.s32 1, %v1864_v3  ;;  %v1873_v6 = vsub.s32 3, %v1864_v3  ;;  %v1893_v25 = vld [vmem:[#allocation6] sm:$0xf] }
  0x6a   :  { %467 = vmatprep.subr.bf16.mxu1 %v1367_v28  ;;  %v1168_v60 = vld [vmem:[#allocation8] ss:$0 sm:$0xff]  ;;  %vm1697_vm1 = vmmov 0   ;;  %vm797_vm2 = vcmp.lt.s32.totalorder %v1864_v3, 1  ;;  %s2037_s20 = sld [smem:[#allocation27_spill]] }
  0x6b   :  { %v1407_v8 = vld [vmem:[#allocation12 + $0x18] sm:$0xff]  }
  0x6c   :  { %425 = vmatpush1.bf16.msra.mxu0 %v1369_v29 }
  0x6d   :  { %468 = vmatpush1.bf16.msra.mxu1 %v1370_v30  ;;  %426 = vmatprep.subr.bf16.mxu0 %v1371_v31 }
  0x6e   :  { %469 = vmatprep.subr.bf16.mxu1 %v1373_v32  ;;  %v1899_v32 = vld [vmem:[#allocation6 + $0x4] sm:$0xf] }
  0x70   :  { %427 = vmatpush1.bf16.msra.mxu0 %v1375_v33 }
  0x71   :  { %470 = vmatpush1.bf16.msra.mxu1 %v1376_v34  ;;  %428 = vmatprep.subr.bf16.mxu0 %v1377_v35 }
  0x72   :  { %471 = vmatprep.subr.bf16.mxu1 %v1379_v36 }
  0x74   :  { %429 = vmatpush1.bf16.msra.mxu0 %v1381_v37 }
  0x75   :  { %472 = vmatpush1.bf16.msra.mxu1 %v1382_v38  ;;  %430 = vmatprep.subr.bf16.mxu0 %v1383_v39 }
  0x76   :  { %473 = vmatprep.subr.bf16.mxu1 %v1385_v40 }
  0x78   :  { %431 = vmatpush1.bf16.msra.mxu0 %v1387_v42 }
  0x79   :  { %474 = vmatpush1.bf16.msra.mxu1 %v1388_v43  ;;  %432 = vmatprep.subr.bf16.mxu0 %v1389_v44  ;;  %v1693_v44 = vmov 1  }
  0x7a   :  { %475 = vmatprep.subr.bf16.mxu1 %v1391_v45  ;;  %1339 = vset.pattern.permute.xlu1 %v1693_v44 }
  0x7c   :  { %433 = vmatpush1.bf16.msra.mxu0 %v1393_v46 }
  0x7d   :  { %476 = vmatpush1.bf16.msra.mxu1 %v1394_v47 }
  0xe9   :  { %v162_v9 = vpop.xlane.xlu0 %161 }
  0xea   :  { %v165_v10 = vmul.f32 0.03125, %v162_v9  ;;  %v1878_v9 = vld [vmem:[%s2017_s6] sm:$0xf] }
  0xeb   :  { %v245_v7 = vrot.slane %v1878_v9, %v1870_v5 }
  0xec   :  { %v167_v11 = vsub.f32 %v1831_v1, %v165_v10  ;;  %v241_v10 = vrot.slane %v1878_v9, %v1867_v4 }
  0xed   :  { %v164_v12 = vpop.xlane.xlu0 %163 }
  0xee   :  { %v166_v13 = vmul.f32 0.03125, %v164_v12  ;;  %v1844_v14 = vsel %vm158_vm0, %v167_v11, 0.0  ;;  %v253_v11 = vrot.slane %v1878_v9, %v1873_v6 }
  0xef   :  { %v173_v15 = vmul.f32 %v1844_v14, %v1844_v14 }
  0xf0   :  { %v168_v16 = vsub.f32 %v1834_v2, %v166_v13 }
  0xf1   :  { %175 = vadd.xlane.f32.xlu1 %v173_v15 }
  0xf2   :  { %v1851_v17 = vsel %vm158_vm0, %v168_v16, 0.0 }
  0xf3   :  { %v174_v18 = vmul.f32 %v1851_v17, %v1851_v17 }
  0xf5   :  { %177 = vadd.xlane.f32.xlu1 %v174_v18  ;;  %v730_v18 = vsub.s32 7, %v1864_v3 }
 0x17a   :  { %v176_v48 = vpop.xlane.xlu1 %175 }
 0x17b   :  { %v179_v49 = vmul.f32 0.03125, %v176_v48 }
 0x17d   :  { %v181_v50 = vadd.f32 1e-05, %v179_v49  ;;  %v1395_v49 = vld [vmem:[#allocation11 + $0x38] sm:$0xff]  }
 0x17e   :  { %v178_v51 = vpop.xlane.xlu1 %177 }
 0x17f   :  { %1435 = vrsqrt.f32 %v181_v50  ;;  %v180_v52 = vmul.f32 0.03125, %v178_v51  ;;  %v1694_v50 = vmov 0.0   ;;  %v1695_v51 = vmov 2  }
 0x180   :  { %1275 = vmatprep.subr.bf16.mxu0 %v1694_v50  ;;  %1295 = vmatprep.subr.bf16.mxu1 %v1694_v50 }
 0x181   :  { %v182_v53 = vadd.f32 1e-05, %v180_v52  ;;  %v1396_v52 = vld [vmem:[#allocation11 + $0x30] sm:$0xff]  }
 0x183   :  { %1437 = vrsqrt.f32 %v182_v53  ;;  %v1696_v53 = vmov 3  }
 0x18c   :  { %v1436_v54 = vpop.eup %1435 }
 0x18d   :  { %v185_v55 = vmul.f32 %v1436_v54, %v1844_v14  ;;  %v1397_v54 = vld [vmem:[#allocation11 + $0x28] sm:$0xff]  }
 0x18f   :  { %v193_v59 = vmul.f32 %v1167_v56, %v185_v55 }
 0x190   :  { %v1438_v57 = vpop.eup %1437 }
 0x191   :  { %v186_v58 = vmul.f32 %v1438_v57, %v1851_v17  ;;  %v201_v62 = vadd.f32 %v1168_v60, %v193_v59  ;;  %v1398_v57 = vld [vmem:[#allocation11 + $0x20] sm:$0xff]   ;;  %v1400_v59 = vld [vmem:[#allocation11 + $0x10] sm:$0xff]  }
 0x193   :  { %v194_v61 = vmul.f32 %v1167_v56, %v186_v58  ;;  %v1399_v58 = vld [vmem:[#allocation11 + $0x18] sm:$0xff]  }
 0x195   :  { %v202_v63 = vadd.f32 %v1168_v60, %v194_v61  ;;  %v1401_v60 = vld [vmem:[#allocation11 + $0x8] sm:$0xff]   ;;  %v1402_v61 = vld [vmem:[#allocation11] sm:$0xff]  }
 0x197   :  { %v203_v0 = vpack.c.bf16 %v202_v63, %v201_v62  ;;  %v248_v62 = vsub.s32 2, %v1864_v3  ;;  %v1215_v3 = vld [vmem:[%s2022_s11] ss:$0 sm:$0xff]  ;;  %s1698_s11 = smov [#allocation16]  }
 0x199   :  { %451 = vmatmul.mubr.bf16.vlgmr.msra.gmra.mxu0 %v203_v0  ;;  %494 = vmatmul.mubr.bf16.vlgmr.msra.gmra.mxu1 %v203_v0  ;;  %v249_v63 = vrot.slane %v1878_v9, %v248_v62 }
 0x19a   :  { %1276 = vmatpush3.bf16.msra.mxu0 %v1395_v49  ;;  %1291 = vmatprep.mubr.msk.bf16.mxu0 %vm1697_vm1, %v1694_v50 }
 0x19b   :  { %1277 = vmatprep.subr.bf16.mxu0 %v1694_v50  ;;  %1311 = vmatprep.mubr.msk.bf16.mxu1 %vm1697_vm1, %v1694_v50 }
 0x19e   :  { %1278 = vmatpush3.bf16.msra.mxu0 %v1396_v52 }
 0x19f   :  { %1279 = vmatprep.subr.bf16.mxu0 %v1694_v50 }
 0x1a2   :  { %1280 = vmatpush3.bf16.msra.mxu0 %v1397_v54 }
 0x1a3   :  { %1281 = vmatprep.subr.bf16.mxu0 %v1694_v50 }
 0x1a6   :  { %1282 = vmatpush3.bf16.msra.mxu0 %v1398_v57 }
 0x1a7   :  { %1283 = vmatprep.subr.bf16.mxu0 %v1694_v50 }
 0x1aa   :  { %1284 = vmatpush3.bf16.msra.mxu0 %v1399_v58 }
 0x1ab   :  { %1285 = vmatprep.subr.bf16.mxu0 %v1694_v50 }
 0x1ae   :  { %1286 = vmatpush3.bf16.msra.mxu0 %v1400_v59 }
 0x1af   :  { %1287 = vmatprep.subr.bf16.mxu0 %v1694_v50 }
 0x1b2   :  { %1288 = vmatpush3.bf16.msra.mxu0 %v1401_v60 }
 0x1b3   :  { %1289 = vmatprep.subr.bf16.mxu0 %v1694_v50 }
 0x1b6   :  { %1290 = vmatpush3.bf16.msra.mxu0 %v1402_v61 }
 0x259   :  { %v452_v12 = vpop.f32.mrf.mxu0  ;;  %v1886_v13 = vpop.f32.mrf.mxu1 }
 0x25a   :  { %v453_v16 = vadd.f32 %v452_v12, %v241_v10  ;;  %v496_v0 = vadd.f32 %v1886_v13, %v249_v63  ;;  %v571_v13 = vrot.slane %v1893_v25, %v1870_v5 }
 0x25b   :  { %v454_v14 = vpop.f32.mrf.mxu0  ;;  %v497_v15 = vpop.f32.mrf.mxu1 }
 0x25c   :  { %v455_v17 = vadd.f32 %v454_v14, %v245_v7  ;;  %v498_v19 = vadd.f32 %v497_v15, %v253_v11 }
 0x25d   :  { %v456_v20 = vpop.f32.mrf.mxu0  ;;  %v1889_v21 = vpop.f32.mrf.mxu1 }
 0x25e   :  { %v1891_v22 = vmul.f32 %v455_v17, %v453_v16  ;;  %516 = vmax.xlane.f32.xlu0 %v498_v19  ;;  %v457_v27 = vadd.f32 %v456_v20, %v241_v10  ;;  %v500_v10 = vadd.f32 %v1889_v21, %v249_v63  ;;  %v551_v17 = vrot.slane %v1893_v25, %v1867_v4 }
 0x25f   :  { %v458_v23 = vpop.f32.mrf.mxu0  ;;  %v501_v24 = vpop.f32.mrf.mxu1  ;;  %v555_v21 = vrot.slane %v1899_v32, %v1867_v4 }
 0x260   :  { %v731_v26 = vrot.slane %v1891_v22, %v730_v18  ;;  %v459_v28 = vadd.f32 %v458_v23, %v245_v7  ;;  %v502_v29 = vadd.f32 %v501_v24, %v253_v11  ;;  %v1201_v7 = vmul.f32 -1.442695, %v496_v0 }
 0x261   :  { %v1202_v11 = vmul.f32 -1.442695, %v500_v10 }
 0x262   :  { %v1896_v30 = vmul.f32 %v459_v28, %v457_v27  ;;  %518 = vmax.xlane.f32.xlu1 %v502_v29  ;;  %v736_v31 = vadd.f32 %v731_v26, %v1893_v25  ;;  %v591_v28 = vrot.slane %v1893_v25, %v248_v62 }
 0x264   :  { %v735_v33 = vrot.slane %v1896_v30, %v730_v18  ;;  %738 = vst [vmem:[#allocation16] sm:$0xf] %v736_v31 }
 0x266   :  { %v737_v34 = vadd.f32 %v735_v33, %v1899_v32  ;;  %v611_v33 = vrot.slane %v1893_v25, %v1873_v6 }
 0x268   :  { %739 = vst [vmem:[#allocation16 + $0x4] sm:$0xf] %v737_v34 }
 0x2e7   :  { %v517_v35 = vpop.xlane.xlu0 %516 }
 0x2e8   :  { %v520_v36 = vsub.f32 %v498_v19, %v517_v35  ;;  %v595_v35 = vrot.slane %v1899_v32, %v248_v62 }
 0x2ea   :  { %v522_v37 = vmul.f32 1.442695, %v520_v36 }
 0x2eb   :  { %v519_v38 = vpop.xlane.xlu1 %518 }
 0x2ec   :  { %1439 = vpow2.f32 %v522_v37  ;;  %v521_v39 = vsub.f32 %v502_v29, %v519_v38  ;;  %v575_v29 = vrot.slane %v1899_v32, %v1870_v5 }
 0x2ee   :  { %v524_v40 = vmul.f32 1.442695, %v521_v39 }
 0x2f0   :  { %1441 = vpow2.f32 %v524_v40 }
 0x2f9   :  { %v1440_v42 = vpop.eup %1439 }
 0x2fa   :  { %526 = vadd.xlane.f32.xlu0 %v1440_v42 }
 0x2fd   :  { %v1442_v43 = vpop.eup %1441 }
 0x2fe   :  { %528 = vadd.xlane.f32.xlu1 %v1442_v43 }
 0x383   :  { %v527_v45 = vpop.xlane.xlu0 %526 }
 0x384   :  { %1443 = vrcp.f32 %v527_v45 }
 0x387   :  { %v529_v46 = vpop.xlane.xlu1 %528 }
 0x388   :  { %1445 = vrcp.f32 %v529_v46 }
 0x389   :  { %1447 = vpow2.f32 %v1201_v7 }
 0x38a   :  { %1449 = vpow2.f32 %v1202_v11  ;;  %v1403_v11 = vld [vmem:[#allocation12 + $0x38] sm:$0xff]  }
 0x38b   :  { %1296 = vmatpush3.bf16.msra.mxu1 %v1403_v11 }
 0x38c   :  { %1297 = vmatprep.subr.bf16.mxu1 %v1694_v50 }
 0x391   :  { %v1444_v47 = vpop.eup %1443 }
 0x392   :  { %v532_v48 = vmul.f32 %v1444_v47, %v1440_v42  ;;  %v615_v42 = vrot.slane %v1899_v32, %v1873_v6 }
 0x394   :  { %561 = vperm.xlu1 %1339, %v532_v48   ;;  %540 = vperm.xlu0 %1338, %v532_v48  }
 0x395   :  { %v1446_v55 = vpop.eup %1445 }
 0x396   :  { %v533_v56 = vmul.f32 %v1446_v55, %v1442_v43  ;;  %v1448_v16 = vpop.eup %1447 }
 0x397   :  { %v1450_v18 = vpop.eup %1449  ;;  %v510_v23 = vadd.f32 1.0, %v1448_v16  ;;  %v1408_v16 = vld [vmem:[#allocation12 + $0x10] sm:$0xff]  }
 0x398   :  { %1340 = vset.pattern.permute.xlu1 %v1695_v51  ;;  %1346 = vset.pattern.permute.xlu0 %v1696_v53  ;;  %v511_v9 = vadd.f32 1.0, %v1450_v18  ;;  %v1410_v18 = vld [vmem:[#allocation12] sm:$0xff]  }
 0x399   :  { %581 = vperm.xlu1 %1340, %v532_v48   ;;  %1451 = vrcp.f32 %v510_v23  ;;  %v1416_v23 = vld [vmem:[#allocation14 + $0x64] ss:$8 sps:$4 sm:$0xff]  }
 0x39a   :  { %1453 = vrcp.f32 %v511_v9  ;;  %v1414_v9 = vld [vmem:[#allocation14 + $0x60] ss:$8 sps:$4 sm:$0xff]  }
 0x39d   :  { %1341 = vset.pattern.permute.xlu1 %v1696_v53 }
 0x39e   :  { %601 = vperm.xlu1 %1341, %v532_v48  }
 0x3a2   :  { %1342 = vset.pattern.permute.xlu1 %v1692_v41 }
 0x3a3   :  { %545 = vperm.xlu1 %1342, %v533_v56  }
 0x3a6   :  { %v1452_v47 = vpop.eup %1451 }
 0x3a7   :  { %1343 = vset.pattern.permute.xlu1 %v1693_v44  ;;  %v1454_v49 = vpop.eup %1453 }
 0x3a8   :  { %565 = vperm.xlu1 %1343, %v533_v56  }
 0x3ac   :  { %1344 = vset.pattern.permute.xlu1 %v1695_v51 }
 0x3ad   :  { %585 = vperm.xlu1 %1344, %v533_v56  }
 0x3b1   :  { %1345 = vset.pattern.permute.xlu1 %v1696_v53 }
 0x3b2   :  { %605 = vperm.xlu1 %1345, %v533_v56  }
 0x40f   :  { %v562_v12 = vpop.permute.xlu1 %561  ;;  %v541_v19 = vpop.permute.xlu0 %540 }
 0x410   :  { %v556_v24 = vmul.f32 %v551_v17, %v541_v19  ;;  %v576_v31 = vmul.f32 %v571_v13, %v562_v12  ;;  %v1404_v12 = vld [vmem:[#allocation12 + $0x30] sm:$0xff]   ;;  %v1409_v17 = vld [vmem:[#allocation12 + $0x8] sm:$0xff]  }
 0x411   :  { %1298 = vmatpush3.bf16.msra.mxu1 %v1404_v12  ;;  %v1411_v19 = vld [vmem:[#allocation14 + $0x70] ss:$8 sps:$4 sm:$0xff]  }
 0x412   :  { %v558_v27 = vadd.f32 %v556_v24, %v1891_v22  ;;  %1299 = vmatprep.subr.bf16.mxu1 %v1694_v50  ;;  %v1419_v24 = vld [vmem:[#allocation14 + $0x54] ss:$8 sps:$4 sm:$0xff]   ;;  %v1417_v13 = vld [vmem:[#allocation14 + $0x50] ss:$8 sps:$4 sm:$0xff]  }
 0x414   :  { %v582_v14 = vpop.permute.xlu1 %581  ;;  %v578_v36 = vadd.f32 %v576_v31, %v558_v27  ;;  %v1425_v27 = vld [vmem:[#allocation14 + $0x34] ss:$8 sps:$4 sm:$0xff]  }
 0x415   :  { %v596_v37 = vmul.f32 %v591_v28, %v582_v14  ;;  %v1405_v14 = vld [vmem:[#allocation12 + $0x28] sm:$0xff]   ;;  %v1423_v28 = vld [vmem:[#allocation14 + $0x30] ss:$8 sps:$4 sm:$0xff]  }
 0x416   :  { %1300 = vmatpush3.bf16.msra.mxu1 %v1405_v14 }
 0x417   :  { %v598_v43 = vadd.f32 %v596_v37, %v578_v36  ;;  %1301 = vmatprep.subr.bf16.mxu1 %v1694_v50 }
 0x419   :  { %v602_v15 = vpop.permute.xlu1 %601 }
 0x41a   :  { %v616_v39 = vmul.f32 %v611_v33, %v602_v15  ;;  %v1406_v15 = vld [vmem:[#allocation12 + $0x20] sm:$0xff]  }
 0x41b   :  { %1302 = vmatpush3.bf16.msra.mxu1 %v1406_v15 }
 0x41c   :  { %v618_v45 = vadd.f32 %v616_v39, %v598_v43  ;;  %1303 = vmatprep.subr.bf16.mxu1 %v1694_v50 }
 0x41e   :  { %v546_v20 = vpop.permute.xlu1 %545  ;;  %v620_v51 = vmul.f32 %v1452_v47, %v618_v45  ;;  %v802_v47 = vld [vmem:[%s2037_s20] sm:$0x1] }
 0x41f   :  { %v557_v34 = vmul.f32 %v555_v21, %v546_v20  ;;  %1304 = vmatpush3.bf16.msra.mxu1 %v1407_v8  ;;  %v1413_v20 = vld [vmem:[#allocation14 + $0x74] ss:$8 sps:$4 sm:$0xff]   ;;  %v1422_v21 = vld [vmem:[#allocation14 + $0x44] ss:$8 sps:$4 sm:$0xff]  }
 0x420   :  { %1305 = vmatprep.subr.bf16.mxu1 %v1694_v50  ;;  %1036 = vmatprep.subr.bf16.mxu0 %v1413_v20 }
 0x421   :  { %v559_v40 = vadd.f32 %v557_v34, %v1896_v30  ;;  %v1211_v30 = vld [vmem:[%s2019_s8] ss:$0 sm:$0xff] }
 0x423   :  { %v566_v26 = vpop.permute.xlu1 %565  ;;  %1306 = vmatpush3.bf16.msra.mxu1 %v1408_v16 }
 0x424   :  { %v577_v4 = vmul.f32 %v575_v29, %v566_v26  ;;  %1307 = vmatprep.subr.bf16.mxu1 %v1694_v50  ;;  %v1420_v26 = vld [vmem:[#allocation14 + $0x40] ss:$8 sps:$4 sm:$0xff]  }
 0x425   :  { %v1426_v29 = vld [vmem:[#allocation14 + $0x20] ss:$8 sps:$4 sm:$0xff]  }
 0x426   :  { %v579_v5 = vadd.f32 %v577_v4, %v559_v40  ;;  %v1213_v40 = vld [vmem:[%s2021_s10] ss:$0 sm:$0xff] }
 0x427   :  { %1308 = vmatpush3.bf16.msra.mxu1 %v1409_v17 }
 0x428   :  { %v586_v38 = vpop.permute.xlu1 %585  ;;  %1309 = vmatprep.subr.bf16.mxu1 %v1694_v50  ;;  %v1428_v50 = vld [vmem:[#allocation14 + $0x24] ss:$8 sps:$4 sm:$0xff]  }
 0x429   :  { %v597_v22 = vmul.f32 %v595_v35, %v586_v38  ;;  %v1212_v38 = vld [vmem:[%s2020_s9] ss:$0 sm:$0xff] }
 0x42b   :  { %v599_v46 = vadd.f32 %v597_v22, %v579_v5  ;;  %1310 = vmatpush3.bf16.msra.mxu1 %v1410_v18 }
 0x42d   :  { %v606_v44 = vpop.permute.xlu1 %605 }
 0x42e   :  { %v617_v25 = vmul.f32 %v615_v42, %v606_v44 }
 0x430   :  { %v619_v48 = vadd.f32 %v617_v25, %v599_v46 }
 0x432   :  { %v621_v52 = vmul.f32 %v1454_v49, %v619_v48  ;;  %v1214_v48 = vld [vmem:[%s2037_s20 + $0x1] sm:$0x1] }
 0x434   :  { %v622_v53 = vpack.c.bf16 %v621_v52, %v620_v51  ;;  %v1216_v52 = vld [vmem:[%s2023_s12] ss:$0 sm:$0xff]  ;;  %s1133_s12 = sshll.u32 %s1698_s11, 4  ;;  %s1134_s12 = int_to_ptr.vmem [resolvable:$true] %s1133_s12 }
 0x435   :  { %s1607_s4 = scalar_lea.vmem %s1134_s12, 128  ;;  %p1612_p8 = scmp.lt.s32.totalorder %s1134_s12, %s1134_s12 }
 0x436   :  { %1292 = vmatmul.mubr.bf16.vlgmr.msra.gmra.mxu0 %v622_v53  ;;  %p1608_p7 = scmp.ne.s32.totalorder %s1134_s12, %s1607_s4  ;;  %p1613_p9 = scmp.lt.s32.totalorder %s1607_s4, %s1607_s4 }
 0x437   :  { %1068 = vmatprep.mubr.bf16.mxu0 %v1692_v41  ;;  %1037 = vmatpush1.bf16.msra.mxu0 %v1411_v19 }
 0x438   :  { %1038 = vmatprep.subr.bf16.mxu0 %v1416_v23  ;;  %p1614_p10 = por %p1613_p9, %p1612_p8 }
 0x43a   :  { %p1615_p11 = pnand %p1614_p10, %p1608_p7 }
 0x43b   :  { %1039 = vmatpush1.bf16.msra.mxu0 %v1414_v9 }
 0x43c   :  { %1040 = vmatprep.subr.bf16.mxu0 %v1419_v24 }
 0x43f   :  { %1041 = vmatpush1.bf16.msra.mxu0 %v1417_v13 }
 0x440   :  { %1042 = vmatprep.subr.bf16.mxu0 %v1422_v21 }
 0x443   :  { %1043 = vmatpush1.bf16.msra.mxu0 %v1420_v26 }
 0x444   :  { %1044 = vmatprep.subr.bf16.mxu0 %v1425_v27 }
 0x447   :  { %1045 = vmatpush1.bf16.msra.mxu0 %v1423_v28 }
 0x448   :  { %1046 = vmatprep.subr.bf16.mxu0 %v1428_v50 }
 0x44b   :  { %1047 = vmatpush1.bf16.msra.mxu0 %v1426_v29 }
 0x4f6   :  { %v721_v6 = vpop.f32.mrf.mxu0 }
 0x4f7   :  { %v747_v32 = vmul.f32 %v1211_v30, %v721_v6 }
 0x4f8   :  { %v1293_v54 = vpop.f32.mrf.mxu0 }
 0x4f9   :  { %v1940_v55 = vadd.f32 %v1831_v1, %v747_v32 }
 0x4fa   :  { %v724_v56 = vpop.f32.mrf.mxu0 }
 0x4fb   :  { %v748_v57 = vmul.f32 %v1211_v30, %v724_v56  ;;  %753 = vadd.xlane.f32.xlu1 %v1940_v55 }
 0x4fc   :  { %v1294_v58 = vpop.f32.mrf.mxu0 }
 0x4fd   :  { %v1944_v59 = vadd.f32 %v1834_v2, %v748_v57 }
 0x4ff   :  { %755 = vadd.xlane.f32.xlu0 %v1944_v59 }
 0x584   :  { %v754_v41 = vpop.xlane.xlu1 %753 }
 0x585   :  { %v757_v60 = vmul.f32 0.03125, %v754_v41 }
 0x587   :  { %v759_v61 = vsub.f32 %v1940_v55, %v757_v60  ;;  %v1431_v60 = vld [vmem:[#allocation14 + $0x14] ss:$8 sps:$4 sm:$0xff]  }
 0x588   :  { %v756_v62 = vpop.xlane.xlu0 %755  ;;  %1048 = vmatprep.subr.bf16.mxu0 %v1431_v60 }
 0x589   :  { %v758_v63 = vmul.f32 0.03125, %v756_v62  ;;  %v1950_v1 = vsel %vm158_vm0, %v759_v61, 0.0  ;;  %v1429_v61 = vld [vmem:[#allocation14 + $0x10] ss:$8 sps:$4 sm:$0xff]   ;;  %v1434_v62 = vld [vmem:[#allocation14 + $0x4] ss:$8 sps:$4 sm:$0xff]  }
 0x58a   :  { %v763_v0 = vmul.f32 %v1950_v1, %v1950_v1  ;;  %1049 = vmatpush1.bf16.msra.mxu0 %v1429_v61 }
 0x58b   :  { %v760_v10 = vsub.f32 %v1944_v59, %v758_v63  ;;  %v1432_v63 = vld [vmem:[#allocation14] ss:$8 sps:$4 sm:$0xff]   ;;  %1050 = vmatprep.subr.bf16.mxu0 %v1434_v62 }
 0x58c   :  { %765 = vadd.xlane.f32.xlu0 %v763_v0 }
 0x58d   :  { %v1957_v2 = vsel %vm158_vm0, %v760_v10, 0.0 }
 0x58e   :  { %v764_v7 = vmul.f32 %v1957_v2, %v1957_v2  ;;  %1051 = vmatpush1.bf16.msra.mxu0 %v1432_v63 }
 0x590   :  { %767 = vadd.xlane.f32.xlu1 %v764_v7 }
 0x615   :  { %v766_v31 = vpop.xlane.xlu0 %765 }
 0x616   :  { %v769_v33 = vmul.f32 0.03125, %v766_v31 }
 0x618   :  { %v771_v34 = vadd.f32 1e-05, %v769_v33 }
 0x619   :  { %v768_v35 = vpop.xlane.xlu1 %767 }
 0x61a   :  { %1455 = vrsqrt.f32 %v771_v34  ;;  %v770_v36 = vmul.f32 0.03125, %v768_v35 }
 0x61c   :  { %v772_v37 = vadd.f32 1e-05, %v770_v36 }
 0x61e   :  { %1457 = vrsqrt.f32 %v772_v37 }
 0x627   :  { %v1456_v4 = vpop.eup %1455 }
 0x628   :  { %v775_v39 = vmul.f32 %v1456_v4, %v1950_v1 }
 0x62a   :  { %v783_v22 = vmul.f32 %v1212_v38, %v775_v39 }
 0x62b   :  { %v1458_v42 = vpop.eup %1457 }
 0x62c   :  { %v776_v43 = vmul.f32 %v1458_v42, %v1957_v2  ;;  %v791_v5 = vadd.f32 %v1213_v40, %v783_v22 }
 0x62e   :  { %v784_v44 = vmul.f32 %v1212_v38, %v776_v43  ;;  %1093 = vst [vmem:[#allocation18 - $0x7] sm:$0x80] %v791_v5  ;;  %v793_v46 = vrot.slane %v791_v5, 7  ;;  %v816_v6 = vmul.f32 %v1215_v3, %v791_v5 }
 0x630   :  { %v792_v45 = vadd.f32 %v1213_v40, %v784_v44 }
 0x632   :  { %v794_v25 = vrot.slane %v792_v45, 7  ;;  %1094 = vst [vmem:[#allocation18 - $0x6] sm:$0x80] %v792_v45  ;;  %v817_v32 = vmul.f32 %v1215_v3, %v792_v45 }
 0x634   :  { %v798_v49 = vsel %vm797_vm2, %v793_v46, %v794_v25  ;;  %v799_v51 = vsel %vm797_vm2, %v794_v25, %v793_v46 }
 0x635   :  { %800 = vst [vmem:[#allocation2] sm:$0xff] %v799_v51  ;;  %801 = vst [vmem:[#allocation2 + $0x8] sm:$0xff] %v798_v49 }
 0x636   :  { %803 = vst [vmem:[#allocation2] sm:$0x1] %v802_v47  ;;  %806 = vst [vmem:[#allocation2 + $0x8] sm:$0x1] %v1214_v48 }
 0x63d   :  { %v807_v53 = vld [vmem:[#allocation2] sm:$0xff]  ;;  %v808_v30 = vld [vmem:[#allocation2 + $0x8] sm:$0xff] }
 0x63e   :  { %v825_v54 = vmul.f32 %v1216_v52, %v807_v53  ;;  %v826_v56 = vmul.f32 %v1216_v52, %v808_v30 }
 0x640   :  { %v827_v57 = vadd.f32 %v825_v54, %v816_v6  ;;  %v828_v58 = vadd.f32 %v826_v56, %v817_v32 }
 0x642   :  { %v829_v41 = vpack.c.bf16 %v828_v58, %v827_v57 }
 0x644   :  { %1312 = vmatmul.mubr.bf16.vlgmr.msra.gmra.mxu1 %v829_v41 }
 0x704   :  { %v928_v1 = vpop.f32.mrf.mxu1 }
 0x705   :  { %v935_v10 = vmax.f32 %v928_v1, 0.0 }
 0x706   :  { %v1313_v0 = vpop.f32.mrf.mxu1 }
 0x707   :  { %v937_v12 = vmul.f32 %v935_v10, %v935_v10 }
 0x708   :  { %v931_v2 = vpop.f32.mrf.mxu1 }
 0x709   :  { %v936_v7 = vmax.f32 %v931_v2, 0.0 }
 0x70a   :  { %v1314_v11 = vpop.f32.mrf.mxu1 }
 0x70b   :  { %v938_v14 = vmul.f32 %v936_v7, %v936_v7 }
 0x70d   :  { %v939_v15 = vpack.c.bf16 %v938_v14, %v937_v12 }
 0x70f   :  { %1069 = vmatmul.mubr.bf16.vlgmr.msra.gmra.mxu0 %v939_v15 }
 0x710   :  { %1618 = shalt.err (!%p1615_p11)
}
 0x711   :  { %1139 = dma.vmem_to_hbm [thread:$0]  %s1134_s12, 128, %s2028_s17, [#allocation17], %s1681_s19, %s1681_s19, %s1682_s1  }
 0x712   :  { %s1699_s25 = smov [#allocation18]  }
 0x713   :  { %s1145_s7 = sshll.u32 %s1699_s25, 4  ;;  %s1146_s7 = int_to_ptr.vmem [resolvable:$true] %s1145_s7 }
 0x714   :  { %s1627_s14 = scalar_lea.vmem %s1146_s7, 32  ;;  %p1632_p13 = scmp.lt.s32.totalorder %s1146_s7, %s1146_s7 }
 0x715   :  { %p1628_p12 = scmp.ne.s32.totalorder %s1146_s7, %s1627_s14  ;;  %p1633_p0 = scmp.lt.s32.totalorder %s1627_s14, %s1627_s14 }
 0x717   :  { %p1634_p1 = por %p1633_p0, %p1632_p13 }
 0x719   :  { %p1635_p2 = pnand %p1634_p1, %p1628_p12 }
 0x71b   :  { %1638 = shalt.err (!%p1635_p2)
}
 0x71c   :  { %s1700_s3 = smov 1   ;;  %v1243_v27 = vld [vmem:[%s2026_s15] ss:$0 sm:$0xff] }
 0x71d   :  { %1151 = dma.vmem_to_hbm [thread:$0]  %s1146_s7, 32, %s2029_s18, [#allocation17], %s1684_s24, %s1684_s24, %s1700_s3  }
 0x71e   :  { %s1701_s18 = smov [#allocation15]  }
 0x71f   :  { %s1121_s24 = sshll.u32 %s1701_s18, 4  ;;  %s1122_s24 = int_to_ptr.vmem [resolvable:$true] %s1121_s24 }
 0x720   :  { %s1647_s8 = scalar_lea.vmem %s1122_s24, 128  ;;  %p1652_p4 = scmp.lt.s32.totalorder %s1122_s24, %s1122_s24 }
 0x721   :  { %p1648_p3 = scmp.ne.s32.totalorder %s1122_s24, %s1647_s8  ;;  %p1653_p5 = scmp.lt.s32.totalorder %s1647_s8, %s1647_s8 }
 0x723   :  { %p1654_p6 = por %p1653_p5, %p1652_p4 }
 0x725   :  { %p1655_p7 = pnand %p1654_p6, %p1648_p3 }
 0x7cf   :  { %v1070_v8 = vpop.f32.mrf.mxu0 }
 0x7d1   :  { %v1072_v16 = vpop.f32.mrf.mxu0 }
 0x7d2   :  { %v1241_v17 = vmul.f32 -1.442695, %v1072_v16 }
 0x7d3   :  { %v1074_v18 = vpop.f32.mrf.mxu0 }
 0x7d4   :  { %1459 = vpow2.f32 %v1241_v17 }
 0x7d5   :  { %v1076_v19 = vpop.f32.mrf.mxu0 }
 0x7d6   :  { %v1242_v20 = vmul.f32 -1.442695, %v1076_v19 }
 0x7d8   :  { %1461 = vpow2.f32 %v1242_v20 }
 0x7e1   :  { %v1460_v23 = vpop.eup %1459 }
 0x7e2   :  { %v1085_v9 = vadd.f32 1.0, %v1460_v23 }
 0x7e4   :  { %1463 = vrcp.f32 %v1085_v9 }
 0x7e5   :  { %v1462_v24 = vpop.eup %1461 }
 0x7e6   :  { %v1086_v13 = vadd.f32 1.0, %v1462_v24 }
 0x7e8   :  { %1465 = vrcp.f32 %v1086_v13 }
 0x7f1   :  { %v1464_v21 = vpop.eup %1463 }
 0x7f2   :  { %v1091_v26 = vmul.f32 %v1464_v21, %v1070_v8 }
 0x7f4   :  { %v1102_v29 = vmul.f32 %v1243_v27, %v1091_v26 }
 0x7f5   :  { %v1466_v28 = vpop.eup %1465 }
 0x7f6   :  { %v1092_v50 = vmul.f32 %v1466_v28, %v1074_v18  ;;  %v1104_v33 = vadd.f32 %v1102_v29, %v1940_v55 }
 0x7f8   :  { %v1103_v31 = vmul.f32 %v1243_v27, %v1092_v50 }
 0x7fa   :  { %v1105_v34 = vadd.f32 %v1103_v31, %v1944_v59 }
 0x7fc   :  { %v1255_v35 = vpack.c.bf16 %v1105_v34, %v1104_v33 }
 0x7fe   :  { %1256 = vst [vmem:[#allocation15] sm:$0xff] %v1255_v35  }
 0x7ff   :  { %1658 = shalt.err (!%p1655_p7)
}
 0x800   :  { %s2038_s29 = sld [smem:[#allocation28_spill]] }
 0x806   :  { %1127 = dma.vmem_to_hbm [thread:$0]  %s1122_s24, 128, %s2038_s29, [#allocation5], %s1681_s19, %s1681_s19, %s1682_s1  }
 0x807   :  { %1675 = dma.done.wait [#allocation5], 128  }
 0x808   :  { %1676 = vsyncadd [#allocation5], 4294967168 }
 0x809   :  { %1677 = dma.done.wait [#allocation17], 160  }
 0x80a   :  { %1678 = vsyncadd [#allocation17], 4294967136 }
 0x80b   :  { %1161 = vsyncpa [#allocation4], 1 }
 0x80c   :  { %1162 = vsyncpa [#allocation7], 1 }
 0x80d   :  { %1163 = vsyncpa [#allocation10], 1 }
 0x80e   :  { %1164 = vsyncpa [#allocation13], 1 }
 0x80f   :  { %1165 = vsyncpa [#allocation5], 1 }
 0x810   :  { %1166 = vsyncpa [#allocation17], 1 }

// kernel: tpu_custom_call.1
= control target key start
LH: loop header
LB: loop body
LE: loop exit
PB: predicated region body
PF: predicated region fallthrough
CT: control target
= control target key end

     0   :  { %s2011_s0 = inlined_call_operand.hbm [shape: bf16[16,128], index: 0, kind: input, shape index: {}]   ;;  %s2012_s1 = inlined_call_operand.hbm [shape: f32[2,4,128], index: 1, kind: input, shape index: {}]   ;;  %s2013_s2 = inlined_call_operand.vmem [shape: f32[2,1,128], index: 2, kind: input, shape index: {}]   ;;  %s2014_s3 = inlined_call_operand.vmem [shape: f32[1,128], index: 3, kind: input, shape index: {}]   ;;  %s2015_s4 = inlined_call_operand.hbm [shape: f32[1,128], index: 4, kind: input, shape index: {}]   ;;  %s2016_s5 = inlined_call_operand.hbm [shape: bf16[128,512], index: 5, kind: input, shape index: {}]   ;;  %s2017_s6 = inlined_call_operand.vmem [shape: f32[1,512], index: 6, kind: input, shape index: {}]   ;;  %s2018_s7 = inlined_call_operand.hbm [shape: bf16[128,128], index: 7, kind: input, shape index: {}]   ;;  %s2019_s8 = inlined_call_operand.vmem [shape: f32[1,128], index: 8, kind: input, shape index: {}]   ;;  %s2020_s9 = inlined_call_operand.vmem [shape: f32[1,128], index: 9, kind: input, shape index: {}]   ;;  %s2021_s10 = inlined_call_operand.vmem [shape: f32[1,128], index: 10, kind: input, shape index: {}]   ;;  %s2022_s11 = inlined_call_operand.vmem [shape: f32[1,128], index: 11, kind: input, shape index: {}]   ;;  %s2023_s12 = inlined_call_operand.vmem [shape: f32[1,128], index: 12, kind: input, shape index: {}]   ;;  %s2024_s13 = inlined_call_operand.hbm [shape: bf16[128,128], index: 13, kind: input, shape index: {}]   ;;  %s2025_s14 = inlined_call_operand.hbm [shape: bf16[128,256], index: 14, kind: input, shape index: {}]   ;;  %s2026_s15 = inlined_call_operand.vmem [shape: f32[1,128], index: 15, kind: input, shape index: {}]   ;;  %s2027_s16 = inlined_call_operand.hbm [shape: bf16[16,128], index: 16, kind: output, shape index: {0}]   ;;  %s2028_s17 = inlined_call_operand.hbm [shape: f32[2,4,128], index: 17, kind: output, shape index: {1}]   ;;  %s2029_s18 = inlined_call_operand.hbm [shape: f32[2,1,128], index: 18, kind: output, shape index: {2}]  }
   0x1   :  { %2031 = sst [smem:[#allocation25_spill]] %s2011_s0 }
   0x2   :  { %2032 = sst [smem:[#allocation26_spill]] %s2012_s1 }
   0x3   :  { %2033 = sst [smem:[#allocation27_spill]] %s2013_s2 }
   0x4   :  { %2034 = sst [smem:[#allocation28_spill]] %s2027_s16 }
   0x5   :  { %24 = vsyncpa [#allocation4], 0 }
   0x6   :  { %25 = vsyncpa [#allocation7], 0 }
   0x7   :  { %26 = vsyncpa [#allocation10], 0 }
   0x8   :  { %27 = vsyncpa [#allocation13], 0 }
   0x9   :  { %28 = vsyncpa [#allocation5], 0 }
   0xa   :  { %29 = vsyncpa [#allocation17], 0  ;;  %s1679_s27 = smov [#allocation6]   ;;  %s1680_s29 = smov [#allocation9]  }
   0xb   :  { %s47_s28 = sshll.u32 %s1679_s27, 4  ;;  %s73_s30 = sshll.u32 %s1680_s29, 4  ;;  %s48_s28 = int_to_ptr.vmem [resolvable:$true] %s47_s28  ;;  %s74_s30 = int_to_ptr.vmem [resolvable:$true] %s73_s30 }
   0xc   :  { %s1475_s0 = scalar_lea.vmem %s48_s28, 128  ;;  %p1480_p1 = scmp.lt.s32.totalorder %s48_s28, %s48_s28 }
   0xd   :  { %p1476_p0 = scmp.ne.s32.totalorder %s48_s28, %s1475_s0  ;;  %p1481_p2 = scmp.lt.s32.totalorder %s1475_s0, %s1475_s0 }
   0xf   :  { %p1482_p3 = por %p1481_p2, %p1480_p1 }
  0x11   :  { %p1483_p4 = pnand %p1482_p3, %p1476_p0 }
  0x13   :  { %1486 = shalt.err (!%p1483_p4)
}
  0x14   :  { %s1681_s19 = smov 64   ;;  %s1682_s1 = smov 4  }
  0x15   :  { %s2035_s22 = sld [smem:[#allocation26_spill]]  ;;  %s1495_s2 = scalar_lea.vmem %s74_s30, 4096 }
  0x16   :  { %p1496_p5 = scmp.ne.s32.totalorder %s74_s30, %s1495_s2  ;;  %p1500_p6 = scmp.lt.s32.totalorder %s74_s30, %s74_s30 }
  0x17   :  { %p1501_p7 = scmp.lt.s32.totalorder %s1495_s2, %s1495_s2 }
  0x19   :  { %p1502_p8 = por %p1501_p7, %p1500_p6 }
  0x1b   :  { %53 = dma.hbm_to_vmem [thread:$0]  %s2035_s22, 128, %s48_s28, [#allocation7], %s1681_s19, %s1681_s19, %s1682_s1  }
  0x1c   :  { %p1503_p9 = pnand %p1502_p8, %p1496_p5 }
  0x1e   :  { %1506 = shalt.err (!%p1503_p9)
}
  0x1f   :  { %s1683_s23 = smov 256   ;;  %s1684_s24 = smov 16  }
  0x20   :  { %79 = dma.hbm_to_vmem [thread:$0]  %s2016_s5, 4096, %s74_s30, [#allocation10], %s1683_s23, %s1683_s23, %s1684_s24  }
  0x21   :  { %s1685_s27 = smov [#allocation12]   ;;  %s1686_s0 = smov [#allocation3]  }
  0x22   :  { %s109_s29 = sshll.u32 %s1685_s27, 4  ;;  %s35_s16 = sshll.u32 %s1686_s0, 4  ;;  %s110_s29 = int_to_ptr.vmem [resolvable:$true] %s109_s29  ;;  %s36_s16 = int_to_ptr.vmem [resolvable:$true] %s35_s16 }
  0x23   :  { %s1515_s28 = scalar_lea.vmem %s110_s29, 1024  ;;  %p1520_p11 = scmp.lt.s32.totalorder %s110_s29, %s110_s29 }
  0x24   :  { %p1516_p10 = scmp.ne.s32.totalorder %s110_s29, %s1515_s28  ;;  %p1521_p12 = scmp.lt.s32.totalorder %s1515_s28, %s1515_s28 }
  0x26   :  { %p1522_p13 = por %p1521_p12, %p1520_p11 }
  0x28   :  { %p1523_p0 = pnand %p1522_p13, %p1516_p10 }
  0x2a   :  { %1526 = shalt.err (!%p1523_p0)
}
  0x2b   :  { %115 = dma.hbm_to_vmem [thread:$0]  %s2024_s13, 1024, %s110_s29, [#allocation13], %s1681_s19, %s1681_s19, %s1682_s1  }
  0x2c   :  { %s1535_s5 = scalar_lea.vmem %s36_s16, 128  ;;  %p1540_p2 = scmp.lt.s32.totalorder %s36_s16, %s36_s16 }
  0x2d   :  { %p1536_p1 = scmp.ne.s32.totalorder %s36_s16, %s1535_s5  ;;  %p1541_p3 = scmp.lt.s32.totalorder %s1535_s5, %s1535_s5 }
  0x2f   :  { %p1542_p4 = por %p1541_p3, %p1540_p2 }
  0x31   :  { %p1543_p5 = pnand %p1542_p4, %p1536_p1 }
  0x33   :  { %1546 = shalt.err (!%p1543_p5)
}
  0x34   :  { %s2036_s2 = sld [smem:[#allocation25_spill]]  ;;  %s1687_s23 = smov [#allocation8]  }
  0x35   :  { %s64_s25 = sshll.u32 %s1687_s23, 4  ;;  %s1688_s26 = smov [#allocation11]   ;;  %s65_s25 = int_to_ptr.vmem [resolvable:$true] %s64_s25 }
  0x36   :  { %s87_s27 = sshll.u32 %s1688_s26, 4  ;;  %s1555_s13 = scalar_lea.vmem %s65_s25, 16  ;;  %s88_s27 = int_to_ptr.vmem [resolvable:$true] %s87_s27 }
  0x37   :  { %p1556_p6 = scmp.ne.s32.totalorder %s65_s25, %s1555_s13  ;;  %s1559_s29 = scalar_lea.vmem %s65_s25, 32 }
  0x38   :  { %p1560_p7 = scmp.lt.s32.totalorder %s65_s25, %s65_s25  ;;  %p1561_p8 = scmp.lt.s32.totalorder %s1559_s29, %s1555_s13 }
  0x3a   :  { %41 = dma.hbm_to_vmem [thread:$0]  %s2036_s2, 128, %s36_s16, [#allocation4], %s1681_s19, %s1681_s19, %s1682_s1  }
  0x3b   :  { %p1562_p9 = por %p1561_p8, %p1560_p7 }
  0x3d   :  { %p1563_p10 = pnand %p1562_p9, %p1556_p6 }
  0x3f   :  { %1566 = shalt.err (!%p1563_p10)
}
  0x40   :  { %67 = dma.hbm_to_vmem [thread:$0]  %s2015_s4, 16, %s65_s25, [#allocation7]  }
  0x41   :  { %s1575_s20 = scalar_lea.vmem %s88_s27, 1024  ;;  %p1580_p12 = scmp.lt.s32.totalorder %s88_s27, %s88_s27 }
  0x42   :  { %p1576_p11 = scmp.ne.s32.totalorder %s88_s27, %s1575_s20  ;;  %p1581_p13 = scmp.lt.s32.totalorder %s1575_s20, %s1575_s20 }
  0x44   :  { %p1582_p0 = por %p1581_p13, %p1580_p12 }
  0x46   :  { %p1583_p1 = pnand %p1582_p0, %p1576_p11 }
  0x48   :  { %1586 = shalt.err (!%p1583_p1)
}
  0x49   :  { %93 = dma.hbm_to_vmem [thread:$0]  %s2018_s7, 1024, %s88_s27, [#allocation10], %s1681_s19, %s1681_s19, %s1682_s1  }
  0x4a   :  { %s1689_s5 = smov [#allocation14]  }
  0x4b   :  { %s121_s30 = sshll.u32 %s1689_s5, 4  ;;  %s122_s30 = int_to_ptr.vmem [resolvable:$true] %s121_s30 }
  0x4c   :  { %s1595_s22 = scalar_lea.vmem %s122_s30, 2048  ;;  %p1600_p3 = scmp.lt.s32.totalorder %s122_s30, %s122_s30 }
  0x4d   :  { %p1596_p2 = scmp.ne.s32.totalorder %s122_s30, %s1595_s22  ;;  %p1601_p4 = scmp.lt.s32.totalorder %s1595_s22, %s1595_s22 }
  0x4f   :  { %p1602_p5 = por %p1601_p4, %p1600_p3 }
  0x51   :  { %p1603_p6 = pnand %p1602_p5, %p1596_p2 }
  0x53   :  { %1606 = shalt.err (!%p1603_p6)
}
  0x54   :  { %s1690_s4 = smov 128   ;;  %s1691_s2 = smov 8  }
  0x55   :  { %127 = dma.hbm_to_vmem [thread:$0]  %s2025_s14, 2048, %s122_s30, [#allocation13], %s1690_s4, %s1690_s4, %s1691_s2  }
  0x56   :  { %1667 = dma.done.wait [#allocation4], 128  }
  0x57   :  { %1668 = vsyncadd [#allocation4], 4294967168 }
  0x58   :  { %1669 = dma.done.wait [#allocation7], 144  }
  0x59   :  { %1670 = vsyncadd [#allocation7], 4294967152 }
  0x5a   :  { %1671 = dma.done.wait [#allocation10], 5120  }
  0x5b   :  { %1672 = vsyncadd [#allocation10], 4294962176 }
  0x5c   :  { %1673 = dma.done.wait [#allocation13], 3072  }
  0x5d   :  { %1674 = vsyncadd [#allocation13], 4294964224  ;;  %v1249_v0 = vld [vmem:[#allocation3] sm:$0xff]   ;;  %v1352_v6 = vld [vmem:[#allocation9 + $0xe8] ss:$16 sps:$4 sm:$0xff]   ;;  %v156_v7 = vlaneseq  ;;  %v1692_v41 = vmov 0  }
  0x5e   :  { %v1831_v1 = vunpack.c.l.bf16 %v1249_v0  ;;  %v1834_v2 = vunpack.c.h.bf16 %v1249_v0  ;;  %v1347_v3 = vld [vmem:[#allocation9 + $0xe4] ss:$16 sps:$4 sm:$0xff]   ;;  %v1349_v4 = vld [vmem:[#allocation9 + $0xec] ss:$16 sps:$4 sm:$0xff]   ;;  %v1351_v5 = vld [vmem:[#allocation9 + $0xe0] ss:$16 sps:$4 sm:$0xff]   ;;  %450 = vmatprep.mubr.bf16.mxu0 %v1692_v41  ;;  %493 = vmatprep.mubr.bf16.mxu1 %v1692_v41 }
  0x5f   :  { %418 = vmatprep.subr.bf16.mxu0 %v1347_v3  ;;  %461 = vmatprep.subr.bf16.mxu1 %v1349_v4  ;;  %v1838_v8 = vand.u32 127, %v156_v7  ;;  %v1353_v19 = vld [vmem:[#allocation9 + $0xc4] ss:$16 sps:$4 sm:$0xff]   ;;  %v1355_v20 = vld [vmem:[#allocation9 + $0xcc] ss:$16 sps:$4 sm:$0xff]   ;;  %v1864_v3 = vshrl.u32 %v156_v7, 7 }
  0x60   :  { %161 = vadd.xlane.f32.xlu0 %v1831_v1  ;;  %419 = vmatpush1.bf16.msra.mxu0 %v1351_v5  ;;  %v1357_v21 = vld [vmem:[#allocation9 + $0xc0] ss:$16 sps:$4 sm:$0xff]   ;;  %v1358_v22 = vld [vmem:[#allocation9 + $0xc8] ss:$16 sps:$4 sm:$0xff]   ;;  %v1359_v23 = vld [vmem:[#allocation9 + $0xa4] ss:$16 sps:$4 sm:$0xff]  }
  0x61   :  { %462 = vmatpush1.bf16.msra.mxu1 %v1352_v6  ;;  %vm158_vm0 = vcmp.lt.s32.totalorder %v1838_v8, 32  ;;  %420 = vmatprep.subr.bf16.mxu0 %v1353_v19  ;;  %v1361_v24 = vld [vmem:[#allocation9 + $0xac] ss:$16 sps:$4 sm:$0xff]   ;;  %v1363_v25 = vld [vmem:[#allocation9 + $0xa0] ss:$16 sps:$4 sm:$0xff]   ;;  %v1867_v4 = vsub.s32 0, %v1864_v3 }
  0x62   :  { %463 = vmatprep.subr.bf16.mxu1 %v1355_v20  ;;  %v1364_v26 = vld [vmem:[#allocation9 + $0xa8] ss:$16 sps:$4 sm:$0xff]   ;;  %v1365_v27 = vld [vmem:[#allocation9 + $0x84] ss:$16 sps:$4 sm:$0xff]   ;;  %v1367_v28 = vld [vmem:[#allocation9 + $0x8c] ss:$16 sps:$4 sm:$0xff]   ;;  %1338 = vset.pattern.permute.xlu0 %v1692_v41 }
  0x63   :  { %v1369_v29 = vld [vmem:[#allocation9 + $0x80] ss:$16 sps:$4 sm:$0xff]   ;;  %v1370_v30 = vld [vmem:[#allocation9 + $0x88] ss:$16 sps:$4 sm:$0xff]   ;;  %v1371_v31 = vld [vmem:[#allocation9 + $0x64] ss:$16 sps:$4 sm:$0xff]  }
  0x64   :  { %163 = vadd.xlane.f32.xlu0 %v1834_v2  ;;  %421 = vmatpush1.bf16.msra.mxu0 %v1357_v21  ;;  %v1373_v32 = vld [vmem:[#allocation9 + $0x6c] ss:$16 sps:$4 sm:$0xff]   ;;  %v1375_v33 = vld [vmem:[#allocation9 + $0x60] ss:$16 sps:$4 sm:$0xff]   ;;  %v1376_v34 = vld [vmem:[#allocation9 + $0x68] ss:$16 sps:$4 sm:$0xff]  }
  0x65   :  { %464 = vmatpush1.bf16.msra.mxu1 %v1358_v22  ;;  %422 = vmatprep.subr.bf16.mxu0 %v1359_v23  ;;  %v1377_v35 = vld [vmem:[#allocation9 + $0x44] ss:$16 sps:$4 sm:$0xff]   ;;  %v1379_v36 = vld [vmem:[#allocation9 + $0x4c] ss:$16 sps:$4 sm:$0xff]   ;;  %v1381_v37 = vld [vmem:[#allocation9 + $0x40] ss:$16 sps:$4 sm:$0xff]  }
  0x66   :  { %465 = vmatprep.subr.bf16.mxu1 %v1361_v24  ;;  %v1382_v38 = vld [vmem:[#allocation9 + $0x48] ss:$16 sps:$4 sm:$0xff]   ;;  %v1383_v39 = vld [vmem:[#allocation9 + $0x24] ss:$16 sps:$4 sm:$0xff]   ;;  %v1385_v40 = vld [vmem:[#allocation9 + $0x2c] ss:$16 sps:$4 sm:$0xff]  }
  0x67   :  { %v1387_v42 = vld [vmem:[#allocation9 + $0x20] ss:$16 sps:$4 sm:$0xff]   ;;  %v1388_v43 = vld [vmem:[#allocation9 + $0x28] ss:$16 sps:$4 sm:$0xff]   ;;  %v1389_v44 = vld [vmem:[#allocation9 + $0x4] ss:$16 sps:$4 sm:$0xff]  }
  0x68   :  { %423 = vmatpush1.bf16.msra.mxu0 %v1363_v25  ;;  %v1391_v45 = vld [vmem:[#allocation9 + $0xc] ss:$16 sps:$4 sm:$0xff]   ;;  %v1393_v46 = vld [vmem:[#allocation9] ss:$16 sps:$4 sm:$0xff]   ;;  %v1394_v47 = vld [vmem:[#allocation9 + $0x8] ss:$16 sps:$4 sm:$0xff]  }
  0x69   :  { %466 = vmatpush1.bf16.msra.mxu1 %v1364_v26  ;;  %424 = vmatprep.subr.bf16.mxu0 %v1365_v27  ;;  %v1167_v56 = vld [vmem:[%s2014_s3] ss:$0 sm:$0xff]  ;;  %v1870_v5 = vsub.s32 1, %v1864_v3  ;;  %v1873_v6 = vsub.s32 3, %v1864_v3  ;;  %v1893_v25 = vld [vmem:[#allocation6] sm:$0xf] }
  0x6a   :  { %467 = vmatprep.subr.bf16.mxu1 %v1367_v28  ;;  %v1168_v60 = vld [vmem:[#allocation8] ss:$0 sm:$0xff]  ;;  %vm1697_vm1 = vmmov 0   ;;  %vm797_vm2 = vcmp.lt.s32.totalorder %v1864_v3, 1  ;;  %s2037_s20 = sld [smem:[#allocation27_spill]] }
  0x6b   :  { %v1407_v8 = vld [vmem:[#allocation12 + $0x18] sm:$0xff]  }
  0x6c   :  { %425 = vmatpush1.bf16.msra.mxu0 %v1369_v29 }
  0x6d   :  { %468 = vmatpush1.bf16.msra.mxu1 %v1370_v30  ;;  %426 = vmatprep.subr.bf16.mxu0 %v1371_v31 }
  0x6e   :  { %469 = vmatprep.subr.bf16.mxu1 %v1373_v32  ;;  %v1899_v32 = vld [vmem:[#allocation6 + $0x4] sm:$0xf] }
  0x70   :  { %427 = vmatpush1.bf16.msra.mxu0 %v1375_v33 }
  0x71   :  { %470 = vmatpush1.bf16.msra.mxu1 %v1376_v34  ;;  %428 = vmatprep.subr.bf16.mxu0 %v1377_v35 }
  0x72   :  { %471 = vmatprep.subr.bf16.mxu1 %v1379_v36 }
  0x74   :  { %429 = vmatpush1.bf16.msra.mxu0 %v1381_v37 }
  0x75   :  { %472 = vmatpush1.bf16.msra.mxu1 %v1382_v38  ;;  %430 = vmatprep.subr.bf16.mxu0 %v1383_v39 }
  0x76   :  { %473 = vmatprep.subr.bf16.mxu1 %v1385_v40 }
  0x78   :  { %431 = vmatpush1.bf16.msra.mxu0 %v1387_v42 }
  0x79   :  { %474 = vmatpush1.bf16.msra.mxu1 %v1388_v43  ;;  %432 = vmatprep.subr.bf16.mxu0 %v1389_v44  ;;  %v1693_v44 = vmov 1  }
  0x7a   :  { %475 = vmatprep.subr.bf16.mxu1 %v1391_v45  ;;  %1339 = vset.pattern.permute.xlu1 %v1693_v44 }
  0x7c   :  { %433 = vmatpush1.bf16.msra.mxu0 %v1393_v46 }
  0x7d   :  { %476 = vmatpush1.bf16.msra.mxu1 %v1394_v47 }
  0xe9   :  { %v162_v9 = vpop.xlane.xlu0 %161 }
  0xea   :  { %v165_v10 = vmul.f32 0.03125, %v162_v9  ;;  %v1878_v9 = vld [vmem:[%s2017_s6] sm:$0xf] }
  0xeb   :  { %v245_v7 = vrot.slane %v1878_v9, %v1870_v5 }
  0xec   :  { %v167_v11 = vsub.f32 %v1831_v1, %v165_v10  ;;  %v241_v10 = vrot.slane %v1878_v9, %v1867_v4 }
  0xed   :  { %v164_v12 = vpop.xlane.xlu0 %163 }
  0xee   :  { %v166_v13 = vmul.f32 0.03125, %v164_v12  ;;  %v1844_v14 = vsel %vm158_vm0, %v167_v11, 0.0  ;;  %v253_v11 = vrot.slane %v1878_v9, %v1873_v6 }
  0xef   :  { %v173_v15 = vmul.f32 %v1844_v14, %v1844_v14 }
  0xf0   :  { %v168_v16 = vsub.f32 %v1834_v2, %v166_v13 }
  0xf1   :  { %175 = vadd.xlane.f32.xlu1 %v173_v15 }
  0xf2   :  { %v1851_v17 = vsel %vm158_vm0, %v168_v16, 0.0 }
  0xf3   :  { %v174_v18 = vmul.f32 %v1851_v17, %v1851_v17 }
  0xf5   :  { %177 = vadd.xlane.f32.xlu1 %v174_v18  ;;  %v730_v18 = vsub.s32 7, %v1864_v3 }
 0x17a   :  { %v176_v48 = vpop.xlane.xlu1 %175 }
 0x17b   :  { %v179_v49 = vmul.f32 0.03125, %v176_v48 }
 0x17d   :  { %v181_v50 = vadd.f32 1e-05, %v179_v49  ;;  %v1395_v49 = vld [vmem:[#allocation11 + $0x38] sm:$0xff]  }
 0x17e   :  { %v178_v51 = vpop.xlane.xlu1 %177 }
 0x17f   :  { %1435 = vrsqrt.f32 %v181_v50  ;;  %v180_v52 = vmul.f32 0.03125, %v178_v51  ;;  %v1694_v50 = vmov 0.0   ;;  %v1695_v51 = vmov 2  }
 0x180   :  { %1275 = vmatprep.subr.bf16.mxu0 %v1694_v50  ;;  %1295 = vmatprep.subr.bf16.mxu1 %v1694_v50 }
 0x181   :  { %v182_v53 = vadd.f32 1e-05, %v180_v52  ;;  %v1396_v52 = vld [vmem:[#allocation11 + $0x30] sm:$0xff]  }
 0x183   :  { %1437 = vrsqrt.f32 %v182_v53  ;;  %v1696_v53 = vmov 3  }
 0x18c   :  { %v1436_v54 = vpop.eup %1435 }
 0x18d   :  { %v185_v55 = vmul.f32 %v1436_v54, %v1844_v14  ;;  %v1397_v54 = vld [vmem:[#allocation11 + $0x28] sm:$0xff]  }
 0x18f   :  { %v193_v59 = vmul.f32 %v1167_v56, %v185_v55 }
 0x190   :  { %v1438_v57 = vpop.eup %1437 }
 0x191   :  { %v186_v58 = vmul.f32 %v1438_v57, %v1851_v17  ;;  %v201_v62 = vadd.f32 %v1168_v60, %v193_v59  ;;  %v1398_v57 = vld [vmem:[#allocation11 + $0x20] sm:$0xff]   ;;  %v1400_v59 = vld [vmem:[#allocation11 + $0x10] sm:$0xff]  }
 0x193   :  { %v194_v61 = vmul.f32 %v1167_v56, %v186_v58  ;;  %v1399_v58 = vld [vmem:[#allocation11 + $0x18] sm:$0xff]  }
 0x195   :  { %v202_v63 = vadd.f32 %v1168_v60, %v194_v61  ;;  %v1401_v60 = vld [vmem:[#allocation11 + $0x8] sm:$0xff]   ;;  %v1402_v61 = vld [vmem:[#allocation11] sm:$0xff]  }
 0x197   :  { %v203_v0 = vpack.c.bf16 %v202_v63, %v201_v62  ;;  %v248_v62 = vsub.s32 2, %v1864_v3  ;;  %v1215_v3 = vld [vmem:[%s2022_s11] ss:$0 sm:$0xff]  ;;  %s1698_s11 = smov [#allocation16]  }
 0x199   :  { %451 = vmatmul.mubr.bf16.vlgmr.msra.gmra.mxu0 %v203_v0  ;;  %494 = vmatmul.mubr.bf16.vlgmr.msra.gmra.mxu1 %v203_v0  ;;  %v249_v63 = vrot.slane %v1878_v9, %v248_v62 }
 0x19a   :  { %1276 = vmatpush3.bf16.msra.mxu0 %v1395_v49  ;;  %1291 = vmatprep.mubr.msk.bf16.mxu0 %vm1697_vm1, %v1694_v50 }
 0x19b   :  { %1277 = vmatprep.subr.bf16.mxu0 %v1694_v50  ;;  %1311 = vmatprep.mubr.msk.bf16.mxu1 %vm1697_vm1, %v1694_v50 }
 0x19e   :  { %1278 = vmatpush3.bf16.msra.mxu0 %v1396_v52 }
 0x19f   :  { %1279 = vmatprep.subr.bf16.mxu0 %v1694_v50 }
 0x1a2   :  { %1280 = vmatpush3.bf16.msra.mxu0 %v1397_v54 }
 0x1a3   :  { %1281 = vmatprep.subr.bf16.mxu0 %v1694_v50 }
 0x1a6   :  { %1282 = vmatpush3.bf16.msra.mxu0 %v1398_v57 }
 0x1a7   :  { %1283 = vmatprep.subr.bf16.mxu0 %v1694_v50 }
 0x1aa   :  { %1284 = vmatpush3.bf16.msra.mxu0 %v1399_v58 }
 0x1ab   :  { %1285 = vmatprep.subr.bf16.mxu0 %v1694_v50 }
 0x1ae   :  { %1286 = vmatpush3.bf16.msra.mxu0 %v1400_v59 }
 0x1af   :  { %1287 = vmatprep.subr.bf16.mxu0 %v1694_v50 }
 0x1b2   :  { %1288 = vmatpush3.bf16.msra.mxu0 %v1401_v60 }
 0x1b3   :  { %1289 = vmatprep.subr.bf16.mxu0 %v1694_v50 }
 0x1b6   :  { %1290 = vmatpush3.bf16.msra.mxu0 %v1402_v61 }
 0x259   :  { %v452_v12 = vpop.f32.mrf.mxu0  ;;  %v1886_v13 = vpop.f32.mrf.mxu1 }
 0x25a   :  { %v453_v16 = vadd.f32 %v452_v12, %v241_v10  ;;  %v496_v0 = vadd.f32 %v1886_v13, %v249_v63  ;;  %v571_v13 = vrot.slane %v1893_v25, %v1870_v5 }
 0x25b   :  { %v454_v14 = vpop.f32.mrf.mxu0  ;;  %v497_v15 = vpop.f32.mrf.mxu1 }
 0x25c   :  { %v455_v17 = vadd.f32 %v454_v14, %v245_v7  ;;  %v498_v19 = vadd.f32 %v497_v15, %v253_v11 }
 0x25d   :  { %v456_v20 = vpop.f32.mrf.mxu0  ;;  %v1889_v21 = vpop.f32.mrf.mxu1 }
 0x25e   :  { %v1891_v22 = vmul.f32 %v455_v17, %v453_v16  ;;  %516 = vmax.xlane.f32.xlu0 %v498_v19  ;;  %v457_v27 = vadd.f32 %v456_v20, %v241_v10  ;;  %v500_v10 = vadd.f32 %v1889_v21, %v249_v63  ;;  %v551_v17 = vrot.slane %v1893_v25, %v1867_v4 }
 0x25f   :  { %v458_v23 = vpop.f32.mrf.mxu0  ;;  %v501_v24 = vpop.f32.mrf.mxu1  ;;  %v555_v21 = vrot.slane %v1899_v32, %v1867_v4 }
 0x260   :  { %v731_v26 = vrot.slane %v1891_v22, %v730_v18  ;;  %v459_v28 = vadd.f32 %v458_v23, %v245_v7  ;;  %v502_v29 = vadd.f32 %v501_v24, %v253_v11  ;;  %v1201_v7 = vmul.f32 -1.442695, %v496_v0 }
 0x261   :  { %v1202_v11 = vmul.f32 -1.442695, %v500_v10 }
 0x262   :  { %v1896_v30 = vmul.f32 %v459_v28, %v457_v27  ;;  %518 = vmax.xlane.f32.xlu1 %v502_v29  ;;  %v736_v31 = vadd.f32 %v731_v26, %v1893_v25  ;;  %v591_v28 = vrot.slane %v1893_v25, %v248_v62 }
 0x264   :  { %v735_v33 = vrot.slane %v1896_v30, %v730_v18  ;;  %738 = vst [vmem:[#allocation16] sm:$0xf] %v736_v31 }
 0x266   :  { %v737_v34 = vadd.f32 %v735_v33, %v1899_v32  ;;  %v611_v33 = vrot.slane %v1893_v25, %v1873_v6 }
 0x268   :  { %739 = vst [vmem:[#allocation16 + $0x4] sm:$0xf] %v737_v34 }
 0x2e7   :  { %v517_v35 = vpop.xlane.xlu0 %516 }
 0x2e8   :  { %v520_v36 = vsub.f32 %v498_v19, %v517_v35  ;;  %v595_v35 = vrot.slane %v1899_v32, %v248_v62 }
 0x2ea   :  { %v522_v37 = vmul.f32 1.442695, %v520_v36 }
 0x2eb   :  { %v519_v38 = vpop.xlane.xlu1 %518 }
 0x2ec   :  { %1439 = vpow2.f32 %v522_v37  ;;  %v521_v39 = vsub.f32 %v502_v29, %v519_v38  ;;  %v575_v29 = vrot.slane %v1899_v32, %v1870_v5 }
 0x2ee   :  { %v524_v40 = vmul.f32 1.442695, %v521_v39 }
 0x2f0   :  { %1441 = vpow2.f32 %v524_v40 }
 0x2f9   :  { %v1440_v42 = vpop.eup %1439 }
 0x2fa   :  { %526 = vadd.xlane.f32.xlu0 %v1440_v42 }
 0x2fd   :  { %v1442_v43 = vpop.eup %1441 }
 0x2fe   :  { %528 = vadd.xlane.f32.xlu1 %v1442_v43 }
 0x383   :  { %v527_v45 = vpop.xlane.xlu0 %526 }
 0x384   :  { %1443 = vrcp.f32 %v527_v45 }
 0x387   :  { %v529_v46 = vpop.xlane.xlu1 %528 }
 0x388   :  { %1445 = vrcp.f32 %v529_v46 }
 0x389   :  { %1447 = vpow2.f32 %v1201_v7 }
 0x38a   :  { %1449 = vpow2.f32 %v1202_v11  ;;  %v1403_v11 = vld [vmem:[#allocation12 + $0x38] sm:$0xff]  }
 0x38b   :  { %1296 = vmatpush3.bf16.msra.mxu1 %v1403_v11 }
 0x38c   :  { %1297 = vmatprep.subr.bf16.mxu1 %v1694_v50 }
 0x391   :  { %v1444_v47 = vpop.eup %1443 }
 0x392   :  { %v532_v48 = vmul.f32 %v1444_v47, %v1440_v42  ;;  %v615_v42 = vrot.slane %v1899_v32, %v1873_v6 }
 0x394   :  { %561 = vperm.xlu1 %1339, %v532_v48   ;;  %540 = vperm.xlu0 %1338, %v532_v48  }
 0x395   :  { %v1446_v55 = vpop.eup %1445 }
 0x396   :  { %v533_v56 = vmul.f32 %v1446_v55, %v1442_v43  ;;  %v1448_v16 = vpop.eup %1447 }
 0x397   :  { %v1450_v18 = vpop.eup %1449  ;;  %v510_v23 = vadd.f32 1.0, %v1448_v16  ;;  %v1408_v16 = vld [vmem:[#allocation12 + $0x10] sm:$0xff]  }
 0x398   :  { %1340 = vset.pattern.permute.xlu1 %v1695_v51  ;;  %1346 = vset.pattern.permute.xlu0 %v1696_v53  ;;  %v511_v9 = vadd.f32 1.0, %v1450_v18  ;;  %v1410_v18 = vld [vmem:[#allocation12] sm:$0xff]  }
 0x399   :  { %581 = vperm.xlu1 %1340, %v532_v48   ;;  %1451 = vrcp.f32 %v510_v23  ;;  %v1416_v23 = vld [vmem:[#allocation14 + $0x64] ss:$8 sps:$4 sm:$0xff]  }
 0x39a   :  { %1453 = vrcp.f32 %v511_v9  ;;  %v1414_v9 = vld [vmem:[#allocation14 + $0x60] ss:$8 sps:$4 sm:$0xff]  }
 0x39d   :  { %1341 = vset.pattern.permute.xlu1 %v1696_v53 }
 0x39e   :  { %601 = vperm.xlu1 %1341, %v532_v48  }
 0x3a2   :  { %1342 = vset.pattern.permute.xlu1 %v1692_v41 }
 0x3a3   :  { %545 = vperm.xlu1 %1342, %v533_v56  }
 0x3a6   :  { %v1452_v47 = vpop.eup %1451 }
 0x3a7   :  { %1343 = vset.pattern.permute.xlu1 %v1693_v44  ;;  %v1454_v49 = vpop.eup %1453 }
 0x3a8   :  { %565 = vperm.xlu1 %1343, %v533_v56  }
 0x3ac   :  { %1344 = vset.pattern.permute.xlu1 %v1695_v51 }
 0x3ad   :  { %585 = vperm.xlu1 %1344, %v533_v56  }
 0x3b1   :  { %1345 = vset.pattern.permute.xlu1 %v1696_v53 }
 0x3b2   :  { %605 = vperm.xlu1 %1345, %v533_v56  }
 0x40f   :  { %v562_v12 = vpop.permute.xlu1 %561  ;;  %v541_v19 = vpop.permute.xlu0 %540 }
 0x410   :  { %v556_v24 = vmul.f32 %v551_v17, %v541_v19  ;;  %v576_v31 = vmul.f32 %v571_v13, %v562_v12  ;;  %v1404_v12 = vld [vmem:[#allocation12 + $0x30] sm:$0xff]   ;;  %v1409_v17 = vld [vmem:[#allocation12 + $0x8] sm:$0xff]  }
 0x411   :  { %1298 = vmatpush3.bf16.msra.mxu1 %v1404_v12  ;;  %v1411_v19 = vld [vmem:[#allocation14 + $0x70] ss:$8 sps:$4 sm:$0xff]  }
 0x412   :  { %v558_v27 = vadd.f32 %v556_v24, %v1891_v22  ;;  %1299 = vmatprep.subr.bf16.mxu1 %v1694_v50  ;;  %v1419_v24 = vld [vmem:[#allocation14 + $0x54] ss:$8 sps:$4 sm:$0xff]   ;;  %v1417_v13 = vld [vmem:[#allocation14 + $0x50] ss:$8 sps:$4 sm:$0xff]  }
 0x414   :  { %v582_v14 = vpop.permute.xlu1 %581  ;;  %v578_v36 = vadd.f32 %v576_v31, %v558_v27  ;;  %v1425_v27 = vld [vmem:[#allocation14 + $0x34] ss:$8 sps:$4 sm:$0xff]  }
 0x415   :  { %v596_v37 = vmul.f32 %v591_v28, %v582_v14  ;;  %v1405_v14 = vld [vmem:[#allocation12 + $0x28] sm:$0xff]   ;;  %v1423_v28 = vld [vmem:[#allocation14 + $0x30] ss:$8 sps:$4 sm:$0xff]  }
 0x416   :  { %1300 = vmatpush3.bf16.msra.mxu1 %v1405_v14 }
 0x417   :  { %v598_v43 = vadd.f32 %v596_v37, %v578_v36  ;;  %1301 = vmatprep.subr.bf16.mxu1 %v1694_v50 }
 0x419   :  { %v602_v15 = vpop.permute.xlu1 %601 }
 0x41a   :  { %v616_v39 = vmul.f32 %v611_v33, %v602_v15  ;;  %v1406_v15 = vld [vmem:[#allocation12 + $0x20] sm:$0xff]  }
 0x41b   :  { %1302 = vmatpush3.bf16.msra.mxu1 %v1406_v15 }
 0x41c   :  { %v618_v45 = vadd.f32 %v616_v39, %v598_v43  ;;  %1303 = vmatprep.subr.bf16.mxu1 %v1694_v50 }
 0x41e   :  { %v546_v20 = vpop.permute.xlu1 %545  ;;  %v620_v51 = vmul.f32 %v1452_v47, %v618_v45  ;;  %v802_v47 = vld [vmem:[%s2037_s20] sm:$0x1] }
 0x41f   :  { %v557_v34 = vmul.f32 %v555_v21, %v546_v20  ;;  %1304 = vmatpush3.bf16.msra.mxu1 %v1407_v8  ;;  %v1413_v20 = vld [vmem:[#allocation14 + $0x74] ss:$8 sps:$4 sm:$0xff]   ;;  %v1422_v21 = vld [vmem:[#allocation14 + $0x44] ss:$8 sps:$4 sm:$0xff]  }
 0x420   :  { %1305 = vmatprep.subr.bf16.mxu1 %v1694_v50  ;;  %1036 = vmatprep.subr.bf16.mxu0 %v1413_v20 }
 0x421   :  { %v559_v40 = vadd.f32 %v557_v34, %v1896_v30  ;;  %v1211_v30 = vld [vmem:[%s2019_s8] ss:$0 sm:$0xff] }
 0x423   :  { %v566_v26 = vpop.permute.xlu1 %565  ;;  %1306 = vmatpush3.bf16.msra.mxu1 %v1408_v16 }
 0x424   :  { %v577_v4 = vmul.f32 %v575_v29, %v566_v26  ;;  %1307 = vmatprep.subr.bf16.mxu1 %v1694_v50  ;;  %v1420_v26 = vld [vmem:[#allocation14 + $0x40] ss:$8 sps:$4 sm:$0xff]  }
 0x425   :  { %v1426_v29 = vld [vmem:[#allocation14 + $0x20] ss:$8 sps:$4 sm:$0xff]  }
 0x426   :  { %v579_v5 = vadd.f32 %v577_v4, %v559_v40  ;;  %v1213_v40 = vld [vmem:[%s2021_s10] ss:$0 sm:$0xff] }
 0x427   :  { %1308 = vmatpush3.bf16.msra.mxu1 %v1409_v17 }
 0x428   :  { %v586_v38 = vpop.permute.xlu1 %585  ;;  %1309 = vmatprep.subr.bf16.mxu1 %v1694_v50  ;;  %v1428_v50 = vld [vmem:[#allocation14 + $0x24] ss:$8 sps:$4 sm:$0xff]  }
 0x429   :  { %v597_v22 = vmul.f32 %v595_v35, %v586_v38  ;;  %v1212_v38 = vld [vmem:[%s2020_s9] ss:$0 sm:$0xff] }
 0x42b   :  { %v599_v46 = vadd.f32 %v597_v22, %v579_v5  ;;  %1310 = vmatpush3.bf16.msra.mxu1 %v1410_v18 }
 0x42d   :  { %v606_v44 = vpop.permute.xlu1 %605 }
 0x42e   :  { %v617_v25 = vmul.f32 %v615_v42, %v606_v44 }
 0x430   :  { %v619_v48 = vadd.f32 %v617_v25, %v599_v46 }
 0x432   :  { %v621_v52 = vmul.f32 %v1454_v49, %v619_v48  ;;  %v1214_v48 = vld [vmem:[%s2037_s20 + $0x1] sm:$0x1] }
 0x434   :  { %v622_v53 = vpack.c.bf16 %v621_v52, %v620_v51  ;;  %v1216_v52 = vld [vmem:[%s2023_s12] ss:$0 sm:$0xff]  ;;  %s1133_s12 = sshll.u32 %s1698_s11, 4  ;;  %s1134_s12 = int_to_ptr.vmem [resolvable:$true] %s1133_s12 }
 0x435   :  { %s1607_s4 = scalar_lea.vmem %s1134_s12, 128  ;;  %p1612_p8 = scmp.lt.s32.totalorder %s1134_s12, %s1134_s12 }
 0x436   :  { %1292 = vmatmul.mubr.bf16.vlgmr.msra.gmra.mxu0 %v622_v53  ;;  %p1608_p7 = scmp.ne.s32.totalorder %s1134_s12, %s1607_s4  ;;  %p1613_p9 = scmp.lt.s32.totalorder %s1607_s4, %s1607_s4 }
 0x437   :  { %1068 = vmatprep.mubr.bf16.mxu0 %v1692_v41  ;;  %1037 = vmatpush1.bf16.msra.mxu0 %v1411_v19 }
 0x438   :  { %1038 = vmatprep.subr.bf16.mxu0 %v1416_v23  ;;  %p1614_p10 = por %p1613_p9, %p1612_p8 }
 0x43a   :  { %p1615_p11 = pnand %p1614_p10, %p1608_p7 }
 0x43b   :  { %1039 = vmatpush1.bf16.msra.mxu0 %v1414_v9 }
 0x43c   :  { %1040 = vmatprep.subr.bf16.mxu0 %v1419_v24 }
 0x43f   :  { %1041 = vmatpush1.bf16.msra.mxu0 %v1417_v13 }
 0x440   :  { %1042 = vmatprep.subr.bf16.mxu0 %v1422_v21 }
 0x443   :  { %1043 = vmatpush1.bf16.msra.mxu0 %v1420_v26 }
 0x444   :  { %1044 = vmatprep.subr.bf16.mxu0 %v1425_v27 }
 0x447   :  { %1045 = vmatpush1.bf16.msra.mxu0 %v1423_v28 }
 0x448   :  { %1046 = vmatprep.subr.bf16.mxu0 %v1428_v50 }
 0x44b   :  { %1047 = vmatpush1.bf16.msra.mxu0 %v1426_v29 }
 0x4f6   :  { %v721_v6 = vpop.f32.mrf.mxu0 }
 0x4f7   :  { %v747_v32 = vmul.f32 %v1211_v30, %v721_v6 }
 0x4f8   :  { %v1293_v54 = vpop.f32.mrf.mxu0 }
 0x4f9   :  { %v1940_v55 = vadd.f32 %v1831_v1, %v747_v32 }
 0x4fa   :  { %v724_v56 = vpop.f32.mrf.mxu0 }
 0x4fb   :  { %v748_v57 = vmul.f32 %v1211_v30, %v724_v56  ;;  %753 = vadd.xlane.f32.xlu1 %v1940_v55 }
 0x4fc   :  { %v1294_v58 = vpop.f32.mrf.mxu0 }
 0x4fd   :  { %v1944_v59 = vadd.f32 %v1834_v2, %v748_v57 }
 0x4ff   :  { %755 = vadd.xlane.f32.xlu0 %v1944_v59 }
 0x584   :  { %v754_v41 = vpop.xlane.xlu1 %753 }
 0x585   :  { %v757_v60 = vmul.f32 0.03125, %v754_v41 }
 0x587   :  { %v759_v61 = vsub.f32 %v1940_v55, %v757_v60  ;;  %v1431_v60 = vld [vmem:[#allocation14 + $0x14] ss:$8 sps:$4 sm:$0xff]  }
 0x588   :  { %v756_v62 = vpop.xlane.xlu0 %755  ;;  %1048 = vmatprep.subr.bf16.mxu0 %v1431_v60 }
 0x589   :  { %v758_v63 = vmul.f32 0.03125, %v756_v62  ;;  %v1950_v1 = vsel %vm158_vm0, %v759_v61, 0.0  ;;  %v1429_v61 = vld [vmem:[#allocation14 + $0x10] ss:$8 sps:$4 sm:$0xff]   ;;  %v1434_v62 = vld [vmem:[#allocation14 + $0x4] ss:$8 sps:$4 sm:$0xff]  }
 0x58a   :  { %v763_v0 = vmul.f32 %v1950_v1, %v1950_v1  ;;  %1049 = vmatpush1.bf16.msra.mxu0 %v1429_v61 }
 0x58b   :  { %v760_v10 = vsub.f32 %v1944_v59, %v758_v63  ;;  %v1432_v63 = vld [vmem:[#allocation14] ss:$8 sps:$4 sm:$0xff]   ;;  %1050 = vmatprep.subr.bf16.mxu0 %v1434_v62 }
 0x58c   :  { %765 = vadd.xlane.f32.xlu0 %v763_v0 }
 0x58d   :  { %v1957_v2 = vsel %vm158_vm0, %v760_v10, 0.0 }
 0x58e   :  { %v764_v7 = vmul.f32 %v1957_v2, %v1957_v2  ;;  %1051 = vmatpush1.bf16.msra.mxu0 %v1432_v63 }
 0x590   :  { %767 = vadd.xlane.f32.xlu1 %v764_v7 }
 0x615   :  { %v766_v31 = vpop.xlane.xlu0 %765 }
 0x616   :  { %v769_v33 = vmul.f32 0.03125, %v766_v31 }
 0x618   :  { %v771_v34 = vadd.f32 1e-05, %v769_v33 }
 0x619   :  { %v768_v35 = vpop.xlane.xlu1 %767 }
 0x61a   :  { %1455 = vrsqrt.f32 %v771_v34  ;;  %v770_v36 = vmul.f32 0.03125, %v768_v35 }
 0x61c   :  { %v772_v37 = vadd.f32 1e-05, %v770_v36 }
 0x61e   :  { %1457 = vrsqrt.f32 %v772_v37 }
 0x627   :  { %v1456_v4 = vpop.eup %1455 }
 0x628   :  { %v775_v39 = vmul.f32 %v1456_v4, %v1950_v1 }
 0x62a   :  { %v783_v22 = vmul.f32 %v1212_v38, %v775_v39 }
 0x62b   :  { %v1458_v42 = vpop.eup %1457 }
 0x62c   :  { %v776_v43 = vmul.f32 %v1458_v42, %v1957_v2  ;;  %v791_v5 = vadd.f32 %v1213_v40, %v783_v22 }
 0x62e   :  { %v784_v44 = vmul.f32 %v1212_v38, %v776_v43  ;;  %1093 = vst [vmem:[#allocation18 - $0x7] sm:$0x80] %v791_v5  ;;  %v793_v46 = vrot.slane %v791_v5, 7  ;;  %v816_v6 = vmul.f32 %v1215_v3, %v791_v5 }
 0x630   :  { %v792_v45 = vadd.f32 %v1213_v40, %v784_v44 }
 0x632   :  { %v794_v25 = vrot.slane %v792_v45, 7  ;;  %1094 = vst [vmem:[#allocation18 - $0x6] sm:$0x80] %v792_v45  ;;  %v817_v32 = vmul.f32 %v1215_v3, %v792_v45 }
 0x634   :  { %v798_v49 = vsel %vm797_vm2, %v793_v46, %v794_v25  ;;  %v799_v51 = vsel %vm797_vm2, %v794_v25, %v793_v46 }
 0x635   :  { %800 = vst [vmem:[#allocation2] sm:$0xff] %v799_v51  ;;  %801 = vst [vmem:[#allocation2 + $0x8] sm:$0xff] %v798_v49 }
 0x636   :  { %803 = vst [vmem:[#allocation2] sm:$0x1] %v802_v47  ;;  %806 = vst [vmem:[#allocation2 + $0x8] sm:$0x1] %v1214_v48 }
 0x63d   :  { %v807_v53 = vld [vmem:[#allocation2] sm:$0xff]  ;;  %v808_v30 = vld [vmem:[#allocation2 + $0x8] sm:$0xff] }
 0x63e   :  { %v825_v54 = vmul.f32 %v1216_v52, %v807_v53  ;;  %v826_v56 = vmul.f32 %v1216_v52, %v808_v30 }
 0x640   :  { %v827_v57 = vadd.f32 %v825_v54, %v816_v6  ;;  %v828_v58 = vadd.f32 %v826_v56, %v817_v32 }
 0x642   :  { %v829_v41 = vpack.c.bf16 %v828_v58, %v827_v57 }
 0x644   :  { %1312 = vmatmul.mubr.bf16.vlgmr.msra.gmra.mxu1 %v829_v41 }
 0x704   :  { %v928_v1 = vpop.f32.mrf.mxu1 }
 0x705   :  { %v935_v10 = vmax.f32 %v928_v1, 0.0 }
 0x706   :  { %v1313_v0 = vpop.f32.mrf.mxu1 }
 0x707   :  { %v937_v12 = vmul.f32 %v935_v10, %v935_v10 }
 0x708   :  { %v931_v2 = vpop.f32.mrf.mxu1 }
 0x709   :  { %v936_v7 = vmax.f32 %v931_v2, 0.0 }
 0x70a   :  { %v1314_v11 = vpop.f32.mrf.mxu1 }
 0x70b   :  { %v938_v14 = vmul.f32 %v936_v7, %v936_v7 }
 0x70d   :  { %v939_v15 = vpack.c.bf16 %v938_v14, %v937_v12 }
 0x70f   :  { %1069 = vmatmul.mubr.bf16.vlgmr.msra.gmra.mxu0 %v939_v15 }
 0x710   :  { %1618 = shalt.err (!%p1615_p11)
}
 0x711   :  { %1139 = dma.vmem_to_hbm [thread:$0]  %s1134_s12, 128, %s2028_s17, [#allocation17], %s1681_s19, %s1681_s19, %s1682_s1  }
 0x712   :  { %s1699_s25 = smov [#allocation18]  }
 0x713   :  { %s1145_s7 = sshll.u32 %s1699_s25, 4  ;;  %s1146_s7 = int_to_ptr.vmem [resolvable:$true] %s1145_s7 }
 0x714   :  { %s1627_s14 = scalar_lea.vmem %s1146_s7, 32  ;;  %p1632_p13 = scmp.lt.s32.totalorder %s1146_s7, %s1146_s7 }
 0x715   :  { %p1628_p12 = scmp.ne.s32.totalorder %s1146_s7, %s1627_s14  ;;  %p1633_p0 = scmp.lt.s32.totalorder %s1627_s14, %s1627_s14 }
 0x717   :  { %p1634_p1 = por %p1633_p0, %p1632_p13 }
 0x719   :  { %p1635_p2 = pnand %p1634_p1, %p1628_p12 }
 0x71b   :  { %1638 = shalt.err (!%p1635_p2)
}
 0x71c   :  { %s1700_s3 = smov 1   ;;  %v1243_v27 = vld [vmem:[%s2026_s15] ss:$0 sm:$0xff] }
 0x71d   :  { %1151 = dma.vmem_to_hbm [thread:$0]  %s1146_s7, 32, %s2029_s18, [#allocation17], %s1684_s24, %s1684_s24, %s1700_s3  }
 0x71e   :  { %s1701_s18 = smov [#allocation15]  }
 0x71f   :  { %s1121_s24 = sshll.u32 %s1701_s18, 4  ;;  %s1122_s24 = int_to_ptr.vmem [resolvable:$true] %s1121_s24 }
 0x720   :  { %s1647_s8 = scalar_lea.vmem %s1122_s24, 128  ;;  %p1652_p4 = scmp.lt.s32.totalorder %s1122_s24, %s1122_s24 }
 0x721   :  { %p1648_p3 = scmp.ne.s32.totalorder %s1122_s24, %s1647_s8  ;;  %p1653_p5 = scmp.lt.s32.totalorder %s1647_s8, %s1647_s8 }
 0x723   :  { %p1654_p6 = por %p1653_p5, %p1652_p4 }
 0x725   :  { %p1655_p7 = pnand %p1654_p6, %p1648_p3 }
 0x7cf   :  { %v1070_v8 = vpop.f32.mrf.mxu0 }
 0x7d1   :  { %v1072_v16 = vpop.f32.mrf.mxu0 }
 0x7d2   :  { %v1241_v17 = vmul.f32 -1.442695, %v1072_v16 }
 0x7d3   :  { %v1074_v18 = vpop.f32.mrf.mxu0 }
 0x7d4   :  { %1459 = vpow2.f32 %v1241_v17 }
 0x7d5   :  { %v1076_v19 = vpop.f32.mrf.mxu0 }
 0x7d6   :  { %v1242_v20 = vmul.f32 -1.442695, %v1076_v19 }
 0x7d8   :  { %1461 = vpow2.f32 %v1242_v20 }
 0x7e1   :  { %v1460_v23 = vpop.eup %1459 }
 0x7e2   :  { %v1085_v9 = vadd.f32 1.0, %v1460_v23 }
 0x7e4   :  { %1463 = vrcp.f32 %v1085_v9 }
 0x7e5   :  { %v1462_v24 = vpop.eup %1461 }
 0x7e6   :  { %v1086_v13 = vadd.f32 1.0, %v1462_v24 }
 0x7e8   :  { %1465 = vrcp.f32 %v1086_v13 }
 0x7f1   :  { %v1464_v21 = vpop.eup %1463 }
 0x7f2   :  { %v1091_v26 = vmul.f32 %v1464_v21, %v1070_v8 }
 0x7f4   :  { %v1102_v29 = vmul.f32 %v1243_v27, %v1091_v26 }
 0x7f5   :  { %v1466_v28 = vpop.eup %1465 }
 0x7f6   :  { %v1092_v50 = vmul.f32 %v1466_v28, %v1074_v18  ;;  %v1104_v33 = vadd.f32 %v1102_v29, %v1940_v55 }
 0x7f8   :  { %v1103_v31 = vmul.f32 %v1243_v27, %v1092_v50 }
 0x7fa   :  { %v1105_v34 = vadd.f32 %v1103_v31, %v1944_v59 }
 0x7fc   :  { %v1255_v35 = vpack.c.bf16 %v1105_v34, %v1104_v33 }
 0x7fe   :  { %1256 = vst [vmem:[#allocation15] sm:$0xff] %v1255_v35  }
 0x7ff   :  { %1658 = shalt.err (!%p1655_p7)
}
 0x800   :  { %s2038_s29 = sld [smem:[#allocation28_spill]] }
 0x806   :  { %1127 = dma.vmem_to_hbm [thread:$0]  %s1122_s24, 128, %s2038_s29, [#allocation5], %s1681_s19, %s1681_s19, %s1682_s1  }
 0x807   :  { %1675 = dma.done.wait [#allocation5], 128  }
 0x808   :  { %1676 = vsyncadd [#allocation5], 4294967168 }
 0x809   :  { %1677 = dma.done.wait [#allocation17], 160  }
 0x80a   :  { %1678 = vsyncadd [#allocation17], 4294967136 }
 0x80b   :  { %1161 = vsyncpa [#allocation4], 1 }
 0x80c   :  { %1162 = vsyncpa [#allocation7], 1 }
 0x80d   :  { %1163 = vsyncpa [#allocation10], 1 }
 0x80e   :  { %1164 = vsyncpa [#allocation13], 1 }
 0x80f   :  { %1165 = vsyncpa [#allocation5], 1 }
 0x810   :  { %1166 = vsyncpa [#allocation17], 1 }

</bundles_post_ra>
